<compile_context>
chip_gen: v6e
topology: v6e:2x2x1
jax: 0.10.0
libtpu: 0.0.40
codegen_flags: <defaults>
</compile_context>

<pallas_src>
import functools

import jax
import jax.numpy as jnp
from jax.experimental import pallas as pl
from jax.experimental.pallas import tpu as pltpu


def _round_up(x, m):
    return ((x + m - 1) // m) * m


# ------------------------------------------------------------------ kernel ---
def _aed2_kernel(x_ref,
                 we1_ref, be1_ref, we2_ref, be2_ref,
                 wd1_ref, bd1_ref, ws1_ref, bs1_ref,
                 ws_ref, cg_ref,
                 wb_ref, bb_ref, wbm_ref,
                 wd2s_ref,
                 out_ref,
                 *, slab, wg_pad, d3_pad):
    f32 = jnp.float32

    def mdot(a, w_ref):
        w = w_ref[...]
        return jnp.dot(a.astype(w.dtype), w, preferred_element_type=f32)

    x = x_ref[...]                                        # (NB, D)

    # ----- encoder: z = W2 tanh(W1 x + b1) + b2 -----
    he = jnp.tanh(mdot(x, we1_ref) + be1_ref[...])        # (NB, He)
    z = mdot(he, we2_ref) + be2_ref[...]                  # (NB, d)

    # ----- decoder / diffusion first (tanh) layers: two separate matmuls -----
    a = jnp.tanh(mdot(z, wd1_ref) + bd1_ref[...])         # (NB, Hd)
    hs = jnp.tanh(mdot(z, ws1_ref) + bs1_ref[...])        # (NB, Hs)

    s = 1.0 - a * a                                       # tanh'
    hpp = -2.0 * a * s                                    # tanh''

    # ----- shared-LHS matmul: dphi slab contribution + g expansion terms -----
    sw = mdot(s, ws_ref)                                  # (NB, slab + 2*wg_pad)
    out = sw[:, :slab]                                    # dphi (already slab-placed)
    ga = sw[:, slab:slab + wg_pad]
    gb = sw[:, slab + wg_pad:]
    out = out + mdot(ga * gb, cg_ref)                     # pullback metric g

    # ----- diffusion b-matrix expansion (shared LHS, bias folded linearly) ---
    hb = mdot(hs, wb_ref) + bb_ref[...]                   # (NB, 2*d3_pad)
    ba = hb[:, :d3_pad]
    bbv = hb[:, d3_pad:]
    babb = ba * bbv
    bm = mdot(babb, wbm_ref)                              # (NB, slab + Hd)
    out = out + bm[:, :slab]                              # bbt contribution
    m = bm[:, slab:]                                      # (NB, Hd)

    out = out + mdot(hpp * m, wd2s_ref)                   # quad-variation drift q

    out_ref[...] = out                                    # one lane-dense store


# ---------------------------------------------------------------- wrapper ---
def aed2_forward(x, p, *, block_n=None, mxu_dtype=jnp.bfloat16):
    N, D = x.shape
    d, Hd = p['wd1'].shape
    Hs = p['ws1'].shape[1]
    f32 = jnp.float32
    d2, d3, Dd = d * d, d * d * d, D * d

    wd1, wd2, ws2, bs2 = p['wd1'], p['wd2'], p['ws2'], p['bs2']
    I_d = jnp.eye(d, dtype=f32)

    # decoder Jacobian weight: wj[h, r*d+j] = wd2[h,r]*wd1[j,h]
    wj = (wd2[:, :, None] * wd1.T[:, None, :]).reshape(Hd, Dd)
    # quad-variation weight: wm[j*d+k, h] = wd1[j,h]*wd1[k,h]
    wm = (wd1[:, None, :] * wd1[None, :, :]).reshape(d2, Hd)

    # pullback metric: g = ((s@wga)*(s@wgb)) @ cg.  Contract over ambient dim
    # (width D*d^2) or hidden dim (width Hd*d^2), whichever is narrower, so the
    # per-step intermediates stay bounded for large D (v7x 64 MiB VMEM).
    if D <= Hd:
        wga = (wd2[:, :, None, None] * wd1.T[:, None, :, None]
               * jnp.ones((1, 1, 1, d), f32)).reshape(Hd, D * d2)
        wgb = (wd2[:, :, None, None] * jnp.ones((1, 1, d, 1), f32)
               * wd1.T[:, None, None, :]).reshape(Hd, D * d2)
        cg = (jnp.ones((D, 1, 1, 1, 1), f32)
              * I_d[None, :, None, :, None]
              * I_d[None, None, :, None, :]).reshape(D * d2, d2)
        wg = D * d2
    else:
        G2 = wd2 @ wd2.T                                   # (Hd, Hd)
        I_H = jnp.eye(Hd, dtype=f32)
        wga = (I_H[:, :, None, None] * wd1.T[None, :, :, None]
               * jnp.ones((1, 1, 1, d), f32)).reshape(Hd, Hd * d2)
        wgb = (G2.T[:, :, None, None] * jnp.ones((1, 1, d, 1), f32)
               * wd1.T[:, None, None, :]).reshape(Hd, Hd * d2)
        cg = (jnp.ones((Hd, 1, 1, 1, 1), f32)
              * I_d[None, :, None, :, None]
              * I_d[None, None, :, None, :]).reshape(Hd * d2, d2)
        wg = Hd * d2

    # latent covariance: bbt = ((bflat@A)*(bflat@B)) @ C, folded into ws2/bs2
    A_b = (I_d[:, None, :, None, None] * jnp.ones((1, 1, 1, d, 1), f32)
           * I_d[None, :, None, None, :]).reshape(d2, d3)
    B_b = (jnp.ones((1, 1, d, 1, 1), f32) * I_d[:, None, None, :, None]
           * I_d[None, :, None, None, :]).reshape(d2, d3)
    C_b = (I_d[:, None, None, :, None] * I_d[None, :, None, None, :]
           * jnp.ones((1, 1, d, 1, 1), f32)).reshape(d3, d2)
    ws2a, ws2b = ws2 @ A_b, ws2 @ B_b                      # (Hs, d3)
    bs2a, bs2b = bs2 @ A_b, bs2 @ B_b                      # (1, d3)

    # ----- lane padding so every in-kernel split is 128-lane aligned -----
    wg_pad = _round_up(wg, 128)
    d3_pad = _round_up(d3, 128)
    slab = _round_up(Dd + 2 * d2 + D, 128)                 # packed output slab
    o_dphi, o_g, o_q, o_bbt = 0, Dd, Dd + d2, Dd + d2 + D

    def pad_cols(m, to):
        return m if m.shape[1] == to else jnp.pad(m, ((0, 0), (0, to - m.shape[1])))

    def pad_rows(m, to):
        return m if m.shape[0] == to else jnp.pad(m, ((0, to - m.shape[0]), (0, 0)))

    def place(m, off):            # position m's columns at [off, off+w) in slab
        return jnp.pad(m, ((0, 0), (off, slab - off - m.shape[1])))

    wj_slab = place(wj, o_dphi)                            # (Hd, slab)
    cg_slab = place(pad_rows(cg, wg_pad), o_g)             # (wg_pad, slab)
    wd2_slab = place(wd2, o_q)                             # (Hd, slab)
    cb_pad = pad_rows(C_b, d3_pad)                         # (d3_pad, d2)
    cb_slab = place(cb_pad, o_bbt)                         # (d3_pad, slab)
    wbm = cb_pad @ wm                                      # (d3_pad, Hd)

    # shared-LHS concatenations -> one wide MXU matmul per LHS
    W_S = jnp.concatenate([wj_slab, pad_cols(wga, wg_pad),
                           pad_cols(wgb, wg_pad)], axis=1)   # (Hd, slab+2*wg_pad)
    W_B = jnp.concatenate([pad_cols(ws2a, d3_pad),
                           pad_cols(ws2b, d3_pad)], axis=1)  # (Hs, 2*d3_pad)
    b_B = jnp.concatenate([pad_cols(bs2a, d3_pad),
                           pad_cols(bs2b, d3_pad)], axis=1)  # (1, 2*d3_pad)
    W_BM = jnp.concatenate([cb_slab, wbm], axis=1)           # (d3_pad, slab+Hd)

    cast = lambda w: w.astype(mxu_dtype)   # MXU operands; biases stay f32
    mats = [cast(p['we1']), p['be1'], cast(p['we2']), p['be2'],
            cast(p['wd1']), p['bd1'], cast(p['ws1']), p['bs1'],
            cast(W_S), cast(cg_slab),
            cast(W_B), b_B, cast(W_BM),
            cast(wd2_slab)]

    # ----- batch tiling: big tiles, >=2 equal steps for v7x megacore -----
    if block_n is None:
        block_n = max(8, min(2048, -(-N // 2)))
    block_n = min(block_n, N)
    if block_n < N and block_n % 8:
        block_n = _round_up(block_n, 8)
    n_blocks = -(-N // block_n)
    Np = n_blocks * block_n
    xp = x if Np == N else jnp.pad(x, ((0, Np - N), (0, 0)))

    def const_spec(arr):
        return pl.BlockSpec(arr.shape, lambda i: (0, 0))

    in_specs = ([pl.BlockSpec((block_n, D), lambda i: (i, 0))]
                + [const_spec(m) for m in mats])
    # TODO(synk): pipeline_mode=pl.Buffered(1) on the constant-weight specs
    # would halve their VMEM double-buffering; left at default for portability.

    kernel = functools.partial(_aed2_kernel, slab=slab, wg_pad=wg_pad,
                               d3_pad=d3_pad)
    out = pl.pallas_call(
        kernel,
        out_shape=jax.ShapeDtypeStruct((Np, slab), f32),
        grid=(n_blocks,),
        in_specs=in_specs,
        out_specs=pl.BlockSpec((block_n, slab), lambda i: (i, 0)),
        compiler_params=pltpu.CompilerParams(dimension_semantics=("parallel",)),
    )(xp, *mats)

    dphi = out[:N, o_dphi:o_dphi + Dd].reshape(N, D, d)
    g = out[:N, o_g:o_g + d2].reshape(N, d, d)
    q = out[:N, o_q:o_q + D]
    bbt = out[:N, o_bbt:o_bbt + d2].reshape(N, d, d)
    return dphi, g, q, bbt


# ---------------------------------------------------- params & reference ----
def init_params(key, D=16, d=4, He=32, Hd=32, Hs=32):
    ks = jax.random.split(key, 11)

    def lin_w(k, fi, fo):
        return jax.random.uniform(k, (fi, fo), jnp.float32, -1.0, 1.0) / jnp.sqrt(fi)

    def lin_b(k, fi, fo):
        return jax.random.uniform(k, (1, fo), jnp.float32, -1.0, 1.0) / jnp.sqrt(fi)

    return dict(
        we1=lin_w(ks[0], D, He),  be1=lin_b(ks[1], D, He),
        we2=lin_w(ks[2], He, d),  be2=lin_b(ks[3], He, d),
        wd1=lin_w(ks[4], d, Hd),  bd1=lin_b(ks[5], d, Hd),
        wd2=lin_w(ks[6], Hd, D),
        ws1=lin_w(ks[7], d, Hs),  bs1=lin_b(ks[8], d, Hs),
        ws2=lin_w(ks[9], Hs, d * d), bs2=lin_b(ks[10], Hs, d * d),
    )
    # TODO(synk): drift_net of LatentNeuralSDE and the decoder output bias are
    # unused by forward() (they do not affect dphi/g/q/bbt) and are omitted.


def reference_forward(x, p):
    """Pure-JAX reference reproducing the PyTorch forward semantics exactly."""
    N = x.shape[0]
    d = p['wd1'].shape[0]
    he = jnp.tanh(x @ p['we1'] + p['be1'])
    z = he @ p['we2'] + p['be2']
    a = jnp.tanh(z @ p['wd1'] + p['bd1'])
    s = 1.0 - a * a
    hpp = -2.0 * a * s
    dphi = jnp.einsum('hr,nh,jh->nrj', p['wd2'], s, p['wd1'])
    g = jnp.einsum('nrj,nrk->njk', dphi, dphi)
    hs = jnp.tanh(z @ p['ws1'] + p['bs1'])
    bmat = (hs @ p['ws2'] + p['bs2']).reshape(N, d, d)
    bbt = jnp.einsum('nij,nkj->nik', bmat, bmat)
    hess = jnp.einsum('hr,nh,jh,kh->nrjk', p['wd2'], hpp, p['wd1'], p['wd1'])
    q = jnp.einsum('njk,nrkj->nr', bbt, hess)
    return dphi, g, q, bbt


def _check(outs, refs, rtol, atol):
    for name, got, want in zip(("dphi", "g", "q", "bbt"), outs, refs):
        assert got.shape == want.shape, (name, got.shape, want.shape)
        err = float(jnp.max(jnp.abs(got - want)))
        assert jnp.allclose(got, want, rtol=rtol, atol=atol), (name, err)


# ------------------------------------------------------------------- main ---
if __name__ == "__main__":
    key = jax.random.PRNGKey(0)
    kx, kp = jax.random.split(key)

    # config 1: D <= Hd (ambient-contraction g form)
    N, D, d, H = 256, 16, 4, 32
    x = jax.random.normal(kx, (N, D), jnp.float32)
    params = init_params(kp, D=D, d=d, He=H, Hd=H, Hs=H)
    refs = reference_forward(x, params)

    # f32 MXU path (tight check)
    fwd32 = jax.jit(functools.partial(aed2_forward, mxu_dtype=jnp.float32))
    _check(jax.block_until_ready(fwd32(x, params)), refs, rtol=5e-3, atol=5e-4)

    # bf16 MXU path (v6e/v7x throughput, f32 accumulation) — looser tolerance
    fwd16 = jax.jit(functools.partial(aed2_forward, mxu_dtype=jnp.bfloat16))
    _check(jax.block_until_ready(fwd16(x, params)), refs, rtol=3e-2, atol=1e-2)

    # config 2: D > Hd (hidden-contraction g form) + ragged batch padding
    N2, D2, d2_, H2 = 200, 48, 3, 16
    x2 = jax.random.normal(kx, (N2, D2), jnp.float32)
    params2 = init_params(jax.random.PRNGKey(1), D=D2, d=d2_, He=H2, Hd=H2, Hs=H2)
    refs2 = reference_forward(x2, params2)
    fwd32b = jax.jit(functools.partial(aed2_forward, mxu_dtype=jnp.float32))
    _check(jax.block_until_ready(fwd32b(x2, params2)), refs2, rtol=5e-3, atol=5e-4)

    print("KERNEL_OK")
</pallas_src>

<mosaic_0001>
module attributes {stable_mosaic.version = 11 : i64} {
  func.func @_aed2_kernel(%arg0: i32, %arg1: memref<128x16xf32, #tpu.memory_space<vmem>>, %arg2: memref<16x32xf32, #tpu.memory_space<vmem>>, %arg3: memref<1x32xf32, #tpu.memory_space<vmem>>, %arg4: memref<32x4xf32, #tpu.memory_space<vmem>>, %arg5: memref<1x4xf32, #tpu.memory_space<vmem>>, %arg6: memref<4x32xf32, #tpu.memory_space<vmem>>, %arg7: memref<1x32xf32, #tpu.memory_space<vmem>>, %arg8: memref<4x32xf32, #tpu.memory_space<vmem>>, %arg9: memref<1x32xf32, #tpu.memory_space<vmem>>, %arg10: memref<32x640xf32, #tpu.memory_space<vmem>>, %arg11: memref<256x128xf32, #tpu.memory_space<vmem>>, %arg12: memref<32x256xf32, #tpu.memory_space<vmem>>, %arg13: memref<1x256xf32, #tpu.memory_space<vmem>>, %arg14: memref<128x160xf32, #tpu.memory_space<vmem>>, %arg15: memref<32x128xf32, #tpu.memory_space<vmem>>, %arg16: memref<128x128xf32, #tpu.memory_space<vmem>>) attributes {dimension_semantics = [#tpu.dimension_semantics<parallel>], iteration_bounds = array<i64: 2>, scalar_prefetch = 0 : i64, scratch_operands = 0 : i64, tpu.core_type = #tpu.core_type<tc>, window_params = [{transform_indices = @transform_0, window_bounds = array<i64: 128, 16>}, {pipeline_mode = #tpu.pipeline_mode<synchronous>, transform_indices = @transform_1, window_bounds = array<i64: 16, 32>}, {pipeline_mode = #tpu.pipeline_mode<synchronous>, transform_indices = @transform_2, window_bounds = array<i64: 1, 32>}, {pipeline_mode = #tpu.pipeline_mode<synchronous>, transform_indices = @transform_3, window_bounds = array<i64: 32, 4>}, {pipeline_mode = #tpu.pipeline_mode<synchronous>, transform_indices = @transform_4, window_bounds = array<i64: 1, 4>}, {pipeline_mode = #tpu.pipeline_mode<synchronous>, transform_indices = @transform_5, window_bounds = array<i64: 4, 32>}, {pipeline_mode = #tpu.pipeline_mode<synchronous>, transform_indices = @transform_6, window_bounds = array<i64: 1, 32>}, {pipeline_mode = #tpu.pipeline_mode<synchronous>, transform_indices = @transform_7, window_bounds = array<i64: 4, 32>}, {pipeline_mode = #tpu.pipeline_mode<synchronous>, transform_indices = @transform_8, window_bounds = array<i64: 1, 32>}, {pipeline_mode = #tpu.pipeline_mode<synchronous>, transform_indices = @transform_9, window_bounds = array<i64: 32, 640>}, {pipeline_mode = #tpu.pipeline_mode<synchronous>, transform_indices = @transform_10, window_bounds = array<i64: 256, 128>}, {pipeline_mode = #tpu.pipeline_mode<synchronous>, transform_indices = @transform_11, window_bounds = array<i64: 32, 256>}, {pipeline_mode = #tpu.pipeline_mode<synchronous>, transform_indices = @transform_12, window_bounds = array<i64: 1, 256>}, {pipeline_mode = #tpu.pipeline_mode<synchronous>, transform_indices = @transform_13, window_bounds = array<i64: 128, 160>}, {pipeline_mode = #tpu.pipeline_mode<synchronous>, transform_indices = @transform_14, window_bounds = array<i64: 32, 128>}, {transform_indices = @transform_15, window_bounds = array<i64: 128, 128>}]} {
    %c0 = arith.constant 0 : index
    %c0_0 = arith.constant 0 : index
    %0 = vector.load %arg1[%c0, %c0_0] : memref<128x16xf32, #tpu.memory_space<vmem>>, vector<128x16xf32>
    %c0_1 = arith.constant 0 : index
    %c0_2 = arith.constant 0 : index
    %1 = vector.load %arg2[%c0_1, %c0_2] : memref<16x32xf32, #tpu.memory_space<vmem>>, vector<16x32xf32>
    %cst = arith.constant dense<0.000000e+00> : vector<128x32xf32>
    %2 = tpu.matmul %0, %1, %cst {dimension_numbers = #tpu.dot_dimension_numbers<[1], [0], [0], [1], [0, 0, 1, 1], [], []>} : vector<128x16xf32>, vector<16x32xf32>, vector<128x32xf32> -> vector<128x32xf32>
    %c0_3 = arith.constant 0 : index
    %c0_4 = arith.constant 0 : index
    %3 = vector.load %arg3[%c0_3, %c0_4] : memref<1x32xf32, #tpu.memory_space<vmem>>, vector<1x32xf32>
    %4 = vector.broadcast %3 : vector<1x32xf32> to vector<128x32xf32>
    %5 = arith.addf %2, %4 : vector<128x32xf32>
    %6 = math.tanh %5 : vector<128x32xf32>
    %c0_5 = arith.constant 0 : index
    %c0_6 = arith.constant 0 : index
    %7 = vector.load %arg4[%c0_5, %c0_6] : memref<32x4xf32, #tpu.memory_space<vmem>>, vector<32x4xf32>
    %cst_7 = arith.constant dense<0.000000e+00> : vector<128x4xf32>
    %8 = tpu.matmul %6, %7, %cst_7 {dimension_numbers = #tpu.dot_dimension_numbers<[1], [0], [0], [1], [0, 0, 1, 1], [], []>} : vector<128x32xf32>, vector<32x4xf32>, vector<128x4xf32> -> vector<128x4xf32>
    %c0_8 = arith.constant 0 : index
    %c0_9 = arith.constant 0 : index
    %9 = vector.load %arg5[%c0_8, %c0_9] : memref<1x4xf32, #tpu.memory_space<vmem>>, vector<1x4xf32>
    %10 = vector.broadcast %9 : vector<1x4xf32> to vector<128x4xf32>
    %11 = arith.addf %8, %10 : vector<128x4xf32>
    %c0_10 = arith.constant 0 : index
    %c0_11 = arith.constant 0 : index
    %12 = vector.load %arg6[%c0_10, %c0_11] : memref<4x32xf32, #tpu.memory_space<vmem>>, vector<4x32xf32>
    %cst_12 = arith.constant dense<0.000000e+00> : vector<128x32xf32>
    %13 = tpu.matmul %11, %12, %cst_12 {dimension_numbers = #tpu.dot_dimension_numbers<[1], [0], [0], [1], [0, 0, 1, 1], [], []>} : vector<128x4xf32>, vector<4x32xf32>, vector<128x32xf32> -> vector<128x32xf32>
    %c0_13 = arith.constant 0 : index
    %c0_14 = arith.constant 0 : index
    %14 = vector.load %arg7[%c0_13, %c0_14] : memref<1x32xf32, #tpu.memory_space<vmem>>, vector<1x32xf32>
    %15 = vector.broadcast %14 : vector<1x32xf32> to vector<128x32xf32>
    %16 = arith.addf %13, %15 : vector<128x32xf32>
    %17 = math.tanh %16 : vector<128x32xf32>
    %c0_15 = arith.constant 0 : index
    %c0_16 = arith.constant 0 : index
    %18 = vector.load %arg8[%c0_15, %c0_16] : memref<4x32xf32, #tpu.memory_space<vmem>>, vector<4x32xf32>
    %cst_17 = arith.constant dense<0.000000e+00> : vector<128x32xf32>
    %19 = tpu.matmul %11, %18, %cst_17 {dimension_numbers = #tpu.dot_dimension_numbers<[1], [0], [0], [1], [0, 0, 1, 1], [], []>} : vector<128x4xf32>, vector<4x32xf32>, vector<128x32xf32> -> vector<128x32xf32>
    %c0_18 = arith.constant 0 : index
    %c0_19 = arith.constant 0 : index
    %20 = vector.load %arg9[%c0_18, %c0_19] : memref<1x32xf32, #tpu.memory_space<vmem>>, vector<1x32xf32>
    %21 = vector.broadcast %20 : vector<1x32xf32> to vector<128x32xf32>
    %22 = arith.addf %19, %21 : vector<128x32xf32>
    %23 = math.tanh %22 : vector<128x32xf32>
    %24 = arith.mulf %17, %17 : vector<128x32xf32>
    %cst_20 = arith.constant 1.000000e+00 : f32
    %25 = vector.broadcast %cst_20 : f32 to vector<128x32xf32>
    %26 = arith.subf %25, %24 : vector<128x32xf32>
    %cst_21 = arith.constant -2.000000e+00 : f32
    %27 = vector.broadcast %cst_21 : f32 to vector<128x32xf32>
    %28 = arith.mulf %27, %17 : vector<128x32xf32>
    %29 = arith.mulf %28, %26 : vector<128x32xf32>
    %c0_22 = arith.constant 0 : index
    %c0_23 = arith.constant 0 : index
    %30 = vector.load %arg10[%c0_22, %c0_23] : memref<32x640xf32, #tpu.memory_space<vmem>>, vector<32x640xf32>
    %cst_24 = arith.constant dense<0.000000e+00> : vector<128x640xf32>
    %31 = tpu.matmul %26, %30, %cst_24 {dimension_numbers = #tpu.dot_dimension_numbers<[1], [0], [0], [1], [0, 0, 1, 1], [], []>} : vector<128x32xf32>, vector<32x640xf32>, vector<128x640xf32> -> vector<128x640xf32>
    %32 = vector.extract_strided_slice %31 {offsets = [0, 0], sizes = [128, 128], strides = [1, 1]} : vector<128x640xf32> to vector<128x128xf32>
    %33 = vector.extract_strided_slice %31 {offsets = [0, 128], sizes = [128, 256], strides = [1, 1]} : vector<128x640xf32> to vector<128x256xf32>
    %34 = vector.extract_strided_slice %31 {offsets = [0, 384], sizes = [128, 256], strides = [1, 1]} : vector<128x640xf32> to vector<128x256xf32>
    %35 = arith.mulf %33, %34 : vector<128x256xf32>
    %c0_25 = arith.constant 0 : index
    %c0_26 = arith.constant 0 : index
    %36 = vector.load %arg11[%c0_25, %c0_26] : memref<256x128xf32, #tpu.memory_space<vmem>>, vector<256x128xf32>
    %cst_27 = arith.constant dense<0.000000e+00> : vector<128x128xf32>
    %37 = tpu.matmul %35, %36, %cst_27 {dimension_numbers = #tpu.dot_dimension_numbers<[1], [0], [0], [1], [0, 0, 1, 1], [], []>} : vector<128x256xf32>, vector<256x128xf32>, vector<128x128xf32> -> vector<128x128xf32>
    %38 = arith.addf %32, %37 : vector<128x128xf32>
    %c0_28 = arith.constant 0 : index
    %c0_29 = arith.constant 0 : index
    %39 = vector.load %arg12[%c0_28, %c0_29] : memref<32x256xf32, #tpu.memory_space<vmem>>, vector<32x256xf32>
    %cst_30 = arith.constant dense<0.000000e+00> : vector<128x256xf32>
    %40 = tpu.matmul %23, %39, %cst_30 {dimension_numbers = #tpu.dot_dimension_numbers<[1], [0], [0], [1], [0, 0, 1, 1], [], []>} : vector<128x32xf32>, vector<32x256xf32>, vector<128x256xf32> -> vector<128x256xf32>
    %c0_31 = arith.constant 0 : index
    %c0_32 = arith.constant 0 : index
    %41 = vector.load %arg13[%c0_31, %c0_32] : memref<1x256xf32, #tpu.memory_space<vmem>>, vector<1x256xf32>
    %42 = vector.broadcast %41 : vector<1x256xf32> to vector<128x256xf32>
    %43 = arith.addf %40, %42 : vector<128x256xf32>
    %44 = vector.extract_strided_slice %43 {offsets = [0, 0], sizes = [128, 128], strides = [1, 1]} : vector<128x256xf32> to vector<128x128xf32>
    %45 = vector.extract_strided_slice %43 {offsets = [0, 128], sizes = [128, 128], strides = [1, 1]} : vector<128x256xf32> to vector<128x128xf32>
    %46 = arith.mulf %44, %45 : vector<128x128xf32>
    %c0_33 = arith.constant 0 : index
    %c0_34 = arith.constant 0 : index
    %47 = vector.load %arg14[%c0_33, %c0_34] : memref<128x160xf32, #tpu.memory_space<vmem>>, vector<128x160xf32>
    %cst_35 = arith.constant dense<0.000000e+00> : vector<128x160xf32>
    %48 = tpu.matmul %46, %47, %cst_35 {dimension_numbers = #tpu.dot_dimension_numbers<[1], [0], [0], [1], [0, 0, 1, 1], [], []>} : vector<128x128xf32>, vector<128x160xf32>, vector<128x160xf32> -> vector<128x160xf32>
    %49 = vector.extract_strided_slice %48 {offsets = [0, 0], sizes = [128, 128], strides = [1, 1]} : vector<128x160xf32> to vector<128x128xf32>
    %50 = arith.addf %38, %49 : vector<128x128xf32>
    %51 = vector.extract_strided_slice %48 {offsets = [0, 128], sizes = [128, 32], strides = [1, 1]} : vector<128x160xf32> to vector<128x32xf32>
    %52 = arith.mulf %29, %51 : vector<128x32xf32>
    %c0_36 = arith.constant 0 : index
    %c0_37 = arith.constant 0 : index
    %53 = vector.load %arg15[%c0_36, %c0_37] : memref<32x128xf32, #tpu.memory_space<vmem>>, vector<32x128xf32>
    %cst_38 = arith.constant dense<0.000000e+00> : vector<128x128xf32>
    %54 = tpu.matmul %52, %53, %cst_38 {dimension_numbers = #tpu.dot_dimension_numbers<[1], [0], [0], [1], [0, 0, 1, 1], [], []>} : vector<128x32xf32>, vector<32x128xf32>, vector<128x128xf32> -> vector<128x128xf32>
    %55 = arith.addf %50, %54 : vector<128x128xf32>
    %c0_39 = arith.constant 0 : index
    %c0_40 = arith.constant 0 : index
    %56 = vector.load %arg16[%c0_39, %c0_40] : memref<128x128xf32, #tpu.memory_space<vmem>>, vector<128x128xf32>
    tpu.vector_store %arg16[%c0_39, %c0_40], %55 {strides = array<i32>} : memref<128x128xf32, #tpu.memory_space<vmem>>, vector<128x128xf32>,
    return
  }
  func.func @transform_0(%arg0: i32) -> (i32, i32) {
    %c0_i32 = arith.constant 0 : i32
    %c0_i32_0 = arith.constant 0 : i32
    return %arg0, %c0_i32 : i32, i32
  }
  func.func @transform_1(%arg0: i32) -> (i32, i32) {
    %c0_i32 = arith.constant 0 : i32
    %c0_i32_0 = arith.constant 0 : i32
    %c0_i32_1 = arith.constant 0 : i32
    return %c0_i32, %c0_i32_0 : i32, i32
  }
  func.func @transform_2(%arg0: i32) -> (i32, i32) {
    %c0_i32 = arith.constant 0 : i32
    %c0_i32_0 = arith.constant 0 : i32
    %c0_i32_1 = arith.constant 0 : i32
    return %c0_i32, %c0_i32_0 : i32, i32
  }
  func.func @transform_3(%arg0: i32) -> (i32, i32) {
    %c0_i32 = arith.constant 0 : i32
    %c0_i32_0 = arith.constant 0 : i32
    %c0_i32_1 = arith.constant 0 : i32
    return %c0_i32, %c0_i32_0 : i32, i32
  }
  func.func @transform_4(%arg0: i32) -> (i32, i32) {
    %c0_i32 = arith.constant 0 : i32
    %c0_i32_0 = arith.constant 0 : i32
    %c0_i32_1 = arith.constant 0 : i32
    return %c0_i32, %c0_i32_0 : i32, i32
  }
  func.func @transform_5(%arg0: i32) -> (i32, i32) {
    %c0_i32 = arith.constant 0 : i32
    %c0_i32_0 = arith.constant 0 : i32
    %c0_i32_1 = arith.constant 0 : i32
    return %c0_i32, %c0_i32_0 : i32, i32
  }
  func.func @transform_6(%arg0: i32) -> (i32, i32) {
    %c0_i32 = arith.constant 0 : i32
    %c0_i32_0 = arith.constant 0 : i32
    %c0_i32_1 = arith.constant 0 : i32
    return %c0_i32, %c0_i32_0 : i32, i32
  }
  func.func @transform_7(%arg0: i32) -> (i32, i32) {
    %c0_i32 = arith.constant 0 : i32
    %c0_i32_0 = arith.constant 0 : i32
    %c0_i32_1 = arith.constant 0 : i32
    return %c0_i32, %c0_i32_0 : i32, i32
  }
  func.func @transform_8(%arg0: i32) -> (i32, i32) {
    %c0_i32 = arith.constant 0 : i32
    %c0_i32_0 = arith.constant 0 : i32
    %c0_i32_1 = arith.constant 0 : i32
    return %c0_i32, %c0_i32_0 : i32, i32
  }
  func.func @transform_9(%arg0: i32) -> (i32, i32) {
    %c0_i32 = arith.constant 0 : i32
    %c0_i32_0 = arith.constant 0 : i32
    %c0_i32_1 = arith.constant 0 : i32
    return %c0_i32, %c0_i32_0 : i32, i32
  }
  func.func @transform_10(%arg0: i32) -> (i32, i32) {
    %c0_i32 = arith.constant 0 : i32
    %c0_i32_0 = arith.constant 0 : i32
    %c0_i32_1 = arith.constant 0 : i32
    return %c0_i32, %c0_i32_0 : i32, i32
  }
  func.func @transform_11(%arg0: i32) -> (i32, i32) {
    %c0_i32 = arith.constant 0 : i32
    %c0_i32_0 = arith.constant 0 : i32
    %c0_i32_1 = arith.constant 0 : i32
    return %c0_i32, %c0_i32_0 : i32, i32
  }
  func.func @transform_12(%arg0: i32) -> (i32, i32) {
    %c0_i32 = arith.constant 0 : i32
    %c0_i32_0 = arith.constant 0 : i32
    %c0_i32_1 = arith.constant 0 : i32
    return %c0_i32, %c0_i32_0 : i32, i32
  }
  func.func @transform_13(%arg0: i32) -> (i32, i32) {
    %c0_i32 = arith.constant 0 : i32
    %c0_i32_0 = arith.constant 0 : i32
    %c0_i32_1 = arith.constant 0 : i32
    return %c0_i32, %c0_i32_0 : i32, i32
  }
  func.func @transform_14(%arg0: i32) -> (i32, i32) {
    %c0_i32 = arith.constant 0 : i32
    %c0_i32_0 = arith.constant 0 : i32
    %c0_i32_1 = arith.constant 0 : i32
    return %c0_i32, %c0_i32_0 : i32, i32
  }
  func.func @transform_15(%arg0: i32) -> (i32, i32) {
    %c0_i32 = arith.constant 0 : i32
    %c0_i32_0 = arith.constant 0 : i32
    return %arg0, %c0_i32 : i32, i32
  }
}

</mosaic_0001>

<bundles_post_ra>
// kernel: mul.85
= control target key start
LH: loop header
LB: loop body
LE: loop exit
PB: predicated region body
PF: predicated region fallthrough
CT: control target
= control target key end

     0   :  { %s868_s0 = inlined_call_operand.vmem [shape: f32[32,16,4], index: 0, kind: input, shape index: {}]   ;;  %s869_s1 = inlined_call_operand.vmem [shape: f32[32,16,4,4], index: 1, kind: output, shape index: {}]  }
   0x1   :  { %v4_v0 = vld [vmem:[%s868_s0] ss:$0 sm:$0xff]  ;;  %v348_v1 = vld [vmem:[%s868_s0 + $0x4] ss:$0 sm:$0xff]  ;;  %v350_v2 = vld [vmem:[%s868_s0 + $0x8] ss:$0 sm:$0xff] }
   0x2   :  { %5 = vst [vmem:[%s869_s1] sm:$0xf] %v4_v0  ;;  %349 = vst [vmem:[%s869_s1 + $0x10] sm:$0xf] %v348_v1  ;;  %v352_v3 = vld [vmem:[%s868_s0 + $0xc] ss:$0 sm:$0xff] }
   0x3   :  { %351 = vst [vmem:[%s869_s1 + $0x20] sm:$0xf] %v350_v2  ;;  %v354_v4 = vld [vmem:[%s868_s0 + $0x10] ss:$0 sm:$0xff]  ;;  %v356_v5 = vld [vmem:[%s868_s0 + $0x14] ss:$0 sm:$0xff] }
   0x4   :  { %353 = vst [vmem:[%s869_s1 + $0x30] sm:$0xf] %v352_v3  ;;  %355 = vst [vmem:[%s869_s1 + $0x40] sm:$0xf] %v354_v4  ;;  %v358_v6 = vld [vmem:[%s868_s0 + $0x18] ss:$0 sm:$0xff] }
   0x5   :  { %357 = vst [vmem:[%s869_s1 + $0x50] sm:$0xf] %v356_v5  ;;  %v360_v7 = vld [vmem:[%s868_s0 + $0x1c] ss:$0 sm:$0xff]  ;;  %v362_v8 = vld [vmem:[%s868_s0 + $0x20] ss:$0 sm:$0xff] }
   0x6   :  { %359 = vst [vmem:[%s869_s1 + $0x60] sm:$0xf] %v358_v6  ;;  %361 = vst [vmem:[%s869_s1 + $0x70] sm:$0xf] %v360_v7  ;;  %v364_v9 = vld [vmem:[%s868_s0 + $0x24] ss:$0 sm:$0xff] }
   0x7   :  { %363 = vst [vmem:[%s869_s1 + $0x80] sm:$0xf] %v362_v8  ;;  %v366_v10 = vld [vmem:[%s868_s0 + $0x28] ss:$0 sm:$0xff]  ;;  %v368_v11 = vld [vmem:[%s868_s0 + $0x2c] ss:$0 sm:$0xff] }
   0x8   :  { %365 = vst [vmem:[%s869_s1 + $0x90] sm:$0xf] %v364_v9  ;;  %367 = vst [vmem:[%s869_s1 + $0xa0] sm:$0xf] %v366_v10  ;;  %v370_v12 = vld [vmem:[%s868_s0 + $0x30] ss:$0 sm:$0xff] }
   0x9   :  { %369 = vst [vmem:[%s869_s1 + $0xb0] sm:$0xf] %v368_v11  ;;  %v372_v13 = vld [vmem:[%s868_s0 + $0x34] ss:$0 sm:$0xff]  ;;  %v374_v14 = vld [vmem:[%s868_s0 + $0x38] ss:$0 sm:$0xff] }
   0xa   :  { %371 = vst [vmem:[%s869_s1 + $0xc0] sm:$0xf] %v370_v12  ;;  %373 = vst [vmem:[%s869_s1 + $0xd0] sm:$0xf] %v372_v13  ;;  %v376_v15 = vld [vmem:[%s868_s0 + $0x3c] ss:$0 sm:$0xff] }
   0xb   :  { %375 = vst [vmem:[%s869_s1 + $0xe0] sm:$0xf] %v374_v14  ;;  %v378_v16 = vld [vmem:[%s868_s0 + $0x1] ss:$0 sm:$0xff]  ;;  %v380_v17 = vld [vmem:[%s868_s0 + $0x5] ss:$0 sm:$0xff] }
   0xc   :  { %377 = vst [vmem:[%s869_s1 + $0xf0] sm:$0xf] %v376_v15  ;;  %379 = vst [vmem:[%s869_s1 + $0x4] sm:$0xf] %v378_v16  ;;  %v382_v18 = vld [vmem:[%s868_s0 + $0x9] ss:$0 sm:$0xff] }
   0xd   :  { %381 = vst [vmem:[%s869_s1 + $0x14] sm:$0xf] %v380_v17  ;;  %v384_v19 = vld [vmem:[%s868_s0 + $0xd] ss:$0 sm:$0xff]  ;;  %v386_v20 = vld [vmem:[%s868_s0 + $0x11] ss:$0 sm:$0xff] }
   0xe   :  { %383 = vst [vmem:[%s869_s1 + $0x24] sm:$0xf] %v382_v18  ;;  %385 = vst [vmem:[%s869_s1 + $0x34] sm:$0xf] %v384_v19  ;;  %v388_v21 = vld [vmem:[%s868_s0 + $0x15] ss:$0 sm:$0xff] }
   0xf   :  { %387 = vst [vmem:[%s869_s1 + $0x44] sm:$0xf] %v386_v20  ;;  %v390_v22 = vld [vmem:[%s868_s0 + $0x19] ss:$0 sm:$0xff]  ;;  %v392_v23 = vld [vmem:[%s868_s0 + $0x1d] ss:$0 sm:$0xff] }
  0x10   :  { %389 = vst [vmem:[%s869_s1 + $0x54] sm:$0xf] %v388_v21  ;;  %391 = vst [vmem:[%s869_s1 + $0x64] sm:$0xf] %v390_v22  ;;  %v394_v24 = vld [vmem:[%s868_s0 + $0x21] ss:$0 sm:$0xff] }
  0x11   :  { %393 = vst [vmem:[%s869_s1 + $0x74] sm:$0xf] %v392_v23  ;;  %v396_v25 = vld [vmem:[%s868_s0 + $0x25] ss:$0 sm:$0xff]  ;;  %v398_v26 = vld [vmem:[%s868_s0 + $0x29] ss:$0 sm:$0xff] }
  0x12   :  { %395 = vst [vmem:[%s869_s1 + $0x84] sm:$0xf] %v394_v24  ;;  %397 = vst [vmem:[%s869_s1 + $0x94] sm:$0xf] %v396_v25  ;;  %v400_v27 = vld [vmem:[%s868_s0 + $0x2d] ss:$0 sm:$0xff] }
  0x13   :  { %399 = vst [vmem:[%s869_s1 + $0xa4] sm:$0xf] %v398_v26  ;;  %v402_v28 = vld [vmem:[%s868_s0 + $0x31] ss:$0 sm:$0xff]  ;;  %v404_v29 = vld [vmem:[%s868_s0 + $0x35] ss:$0 sm:$0xff] }
  0x14   :  { %401 = vst [vmem:[%s869_s1 + $0xb4] sm:$0xf] %v400_v27  ;;  %403 = vst [vmem:[%s869_s1 + $0xc4] sm:$0xf] %v402_v28  ;;  %v406_v30 = vld [vmem:[%s868_s0 + $0x39] ss:$0 sm:$0xff] }
  0x15   :  { %405 = vst [vmem:[%s869_s1 + $0xd4] sm:$0xf] %v404_v29  ;;  %v408_v31 = vld [vmem:[%s868_s0 + $0x3d] ss:$0 sm:$0xff]  ;;  %v410_v32 = vld [vmem:[%s868_s0 + $0x2] ss:$0 sm:$0xff] }
  0x16   :  { %407 = vst [vmem:[%s869_s1 + $0xe4] sm:$0xf] %v406_v30  ;;  %409 = vst [vmem:[%s869_s1 + $0xf4] sm:$0xf] %v408_v31  ;;  %v412_v33 = vld [vmem:[%s868_s0 + $0x6] ss:$0 sm:$0xff] }
  0x17   :  { %411 = vst [vmem:[%s869_s1 + $0x8] sm:$0xf] %v410_v32  ;;  %v414_v34 = vld [vmem:[%s868_s0 + $0xa] ss:$0 sm:$0xff]  ;;  %v416_v35 = vld [vmem:[%s868_s0 + $0xe] ss:$0 sm:$0xff] }
  0x18   :  { %413 = vst [vmem:[%s869_s1 + $0x18] sm:$0xf] %v412_v33  ;;  %415 = vst [vmem:[%s869_s1 + $0x28] sm:$0xf] %v414_v34  ;;  %v418_v36 = vld [vmem:[%s868_s0 + $0x12] ss:$0 sm:$0xff] }
  0x19   :  { %417 = vst [vmem:[%s869_s1 + $0x38] sm:$0xf] %v416_v35  ;;  %v420_v37 = vld [vmem:[%s868_s0 + $0x16] ss:$0 sm:$0xff]  ;;  %v422_v38 = vld [vmem:[%s868_s0 + $0x1a] ss:$0 sm:$0xff] }
  0x1a   :  { %419 = vst [vmem:[%s869_s1 + $0x48] sm:$0xf] %v418_v36  ;;  %421 = vst [vmem:[%s869_s1 + $0x58] sm:$0xf] %v420_v37  ;;  %v424_v39 = vld [vmem:[%s868_s0 + $0x1e] ss:$0 sm:$0xff] }
  0x1b   :  { %423 = vst [vmem:[%s869_s1 + $0x68] sm:$0xf] %v422_v38  ;;  %v426_v40 = vld [vmem:[%s868_s0 + $0x22] ss:$0 sm:$0xff]  ;;  %v428_v41 = vld [vmem:[%s868_s0 + $0x26] ss:$0 sm:$0xff] }
  0x1c   :  { %425 = vst [vmem:[%s869_s1 + $0x78] sm:$0xf] %v424_v39  ;;  %427 = vst [vmem:[%s869_s1 + $0x88] sm:$0xf] %v426_v40  ;;  %v430_v42 = vld [vmem:[%s868_s0 + $0x2a] ss:$0 sm:$0xff] }
  0x1d   :  { %429 = vst [vmem:[%s869_s1 + $0x98] sm:$0xf] %v428_v41  ;;  %v432_v43 = vld [vmem:[%s868_s0 + $0x2e] ss:$0 sm:$0xff]  ;;  %v434_v44 = vld [vmem:[%s868_s0 + $0x32] ss:$0 sm:$0xff] }
  0x1e   :  { %431 = vst [vmem:[%s869_s1 + $0xa8] sm:$0xf] %v430_v42  ;;  %433 = vst [vmem:[%s869_s1 + $0xb8] sm:$0xf] %v432_v43  ;;  %v436_v45 = vld [vmem:[%s868_s0 + $0x36] ss:$0 sm:$0xff] }
  0x1f   :  { %435 = vst [vmem:[%s869_s1 + $0xc8] sm:$0xf] %v434_v44  ;;  %v438_v46 = vld [vmem:[%s868_s0 + $0x3a] ss:$0 sm:$0xff]  ;;  %v440_v47 = vld [vmem:[%s868_s0 + $0x3e] ss:$0 sm:$0xff] }
  0x20   :  { %437 = vst [vmem:[%s869_s1 + $0xd8] sm:$0xf] %v436_v45  ;;  %439 = vst [vmem:[%s869_s1 + $0xe8] sm:$0xf] %v438_v46  ;;  %v442_v48 = vld [vmem:[%s868_s0 + $0x3] ss:$0 sm:$0xff] }
  0x21   :  { %441 = vst [vmem:[%s869_s1 + $0xf8] sm:$0xf] %v440_v47  ;;  %v444_v49 = vld [vmem:[%s868_s0 + $0x7] ss:$0 sm:$0xff]  ;;  %v446_v50 = vld [vmem:[%s868_s0 + $0xb] ss:$0 sm:$0xff] }
  0x22   :  { %443 = vst [vmem:[%s869_s1 + $0xc] sm:$0xf] %v442_v48  ;;  %445 = vst [vmem:[%s869_s1 + $0x1c] sm:$0xf] %v444_v49  ;;  %v448_v51 = vld [vmem:[%s868_s0 + $0xf] ss:$0 sm:$0xff] }
  0x23   :  { %447 = vst [vmem:[%s869_s1 + $0x2c] sm:$0xf] %v446_v50  ;;  %v450_v52 = vld [vmem:[%s868_s0 + $0x13] ss:$0 sm:$0xff]  ;;  %v452_v53 = vld [vmem:[%s868_s0 + $0x17] ss:$0 sm:$0xff] }
  0x24   :  { %449 = vst [vmem:[%s869_s1 + $0x3c] sm:$0xf] %v448_v51  ;;  %451 = vst [vmem:[%s869_s1 + $0x4c] sm:$0xf] %v450_v52  ;;  %v454_v54 = vld [vmem:[%s868_s0 + $0x1b] ss:$0 sm:$0xff] }
  0x25   :  { %453 = vst [vmem:[%s869_s1 + $0x5c] sm:$0xf] %v452_v53  ;;  %v456_v55 = vld [vmem:[%s868_s0 + $0x1f] ss:$0 sm:$0xff]  ;;  %v458_v56 = vld [vmem:[%s868_s0 + $0x23] ss:$0 sm:$0xff] }
  0x26   :  { %455 = vst [vmem:[%s869_s1 + $0x6c] sm:$0xf] %v454_v54  ;;  %457 = vst [vmem:[%s869_s1 + $0x7c] sm:$0xf] %v456_v55  ;;  %v460_v57 = vld [vmem:[%s868_s0 + $0x27] ss:$0 sm:$0xff] }
  0x27   :  { %459 = vst [vmem:[%s869_s1 + $0x8c] sm:$0xf] %v458_v56  ;;  %v462_v58 = vld [vmem:[%s868_s0 + $0x2b] ss:$0 sm:$0xff]  ;;  %v464_v59 = vld [vmem:[%s868_s0 + $0x2f] ss:$0 sm:$0xff] }
  0x28   :  { %461 = vst [vmem:[%s869_s1 + $0x9c] sm:$0xf] %v460_v57  ;;  %463 = vst [vmem:[%s869_s1 + $0xac] sm:$0xf] %v462_v58  ;;  %v466_v60 = vld [vmem:[%s868_s0 + $0x33] ss:$0 sm:$0xff] }
  0x29   :  { %465 = vst [vmem:[%s869_s1 + $0xbc] sm:$0xf] %v464_v59  ;;  %v468_v61 = vld [vmem:[%s868_s0 + $0x37] ss:$0 sm:$0xff]  ;;  %v470_v62 = vld [vmem:[%s868_s0 + $0x3b] ss:$0 sm:$0xff] }
  0x2a   :  { %467 = vst [vmem:[%s869_s1 + $0xcc] sm:$0xf] %v466_v60  ;;  %469 = vst [vmem:[%s869_s1 + $0xdc] sm:$0xf] %v468_v61  ;;  %v472_v63 = vld [vmem:[%s868_s0 + $0x3f] ss:$0 sm:$0xff] }
  0x2b   :  { %471 = vst [vmem:[%s869_s1 + $0xec] sm:$0xf] %v470_v62  ;;  %473 = vst [vmem:[%s869_s1 + $0xfc] sm:$0xf] %v472_v63 }

// kernel: mul.123
= control target key start
LH: loop header
LB: loop body
LE: loop exit
PB: predicated region body
PF: predicated region fallthrough
CT: control target
= control target key end

     0   :  { %s1060_s0 = inlined_call_operand.vmem [shape: f32[4,4,4,4], index: 0, kind: input, shape index: {}]   ;;  %s1061_s1 = inlined_call_operand.vmem [shape: f32[4,4,4,4,4], index: 1, kind: output, shape index: {}]  }
   0x1   :  { %v542_v0 = vld [vmem:[%s1060_s0 + $0x20] ss:$0 sm:$0xff]  ;;  %v544_v2 = vld [vmem:[%s1060_s0 + $0x30] ss:$0 sm:$0xff]  ;;  %v548_v4 = vld [vmem:[%s1060_s0 + $0x14] ss:$0 sm:$0xff] }
   0x2   :  { %v4_v1 = vld [vmem:[%s1060_s0] ss:$0 sm:$0xff]  ;;  %19 = vbcast.lane.b32.xlu1 %v542_v0, 256  ;;  %v540_v3 = vld [vmem:[%s1060_s0 + $0x10] ss:$0 sm:$0xff] }
   0x3   :  { %6 = vbcast.lane.b32.xlu0 %v4_v1, 256  ;;  %v546_v5 = vld [vmem:[%s1060_s0 + $0x4] ss:$0 sm:$0xff]  ;;  %v552_v6 = vld [vmem:[%s1060_s0 + $0x34] ss:$0 sm:$0xff] }
   0x4   :  { %v550_v7 = vld [vmem:[%s1060_s0 + $0x24] ss:$0 sm:$0xff]  ;;  %v556_v8 = vld [vmem:[%s1060_s0 + $0x18] ss:$0 sm:$0xff]  ;;  %v554_v9 = vld [vmem:[%s1060_s0 + $0x8] ss:$0 sm:$0xff] }
   0x5   :  { %v560_v10 = vld [vmem:[%s1060_s0 + $0x38] ss:$0 sm:$0xff]  ;;  %v558_v11 = vld [vmem:[%s1060_s0 + $0x28] ss:$0 sm:$0xff]  ;;  %v564_v12 = vld [vmem:[%s1060_s0 + $0x1c] ss:$0 sm:$0xff] }
   0x6   :  { %26 = vbcast.lane.b32.xlu1 %v544_v2, 256  ;;  %v562_v13 = vld [vmem:[%s1060_s0 + $0xc] ss:$0 sm:$0xff]  ;;  %v568_v14 = vld [vmem:[%s1060_s0 + $0x3c] ss:$0 sm:$0xff] }
   0x7   :  { %12 = vbcast.lane.b32.xlu0 %v540_v3, 256  ;;  %v566_v15 = vld [vmem:[%s1060_s0 + $0x2c] ss:$0 sm:$0xff]  ;;  %v572_v16 = vld [vmem:[%s1060_s0 + $0x11] ss:$0 sm:$0xff] }
   0x8   :  { %v570_v17 = vld [vmem:[%s1060_s0 + $0x1] ss:$0 sm:$0xff]  ;;  %v576_v18 = vld [vmem:[%s1060_s0 + $0x31] ss:$0 sm:$0xff]  ;;  %v580_v20 = vld [vmem:[%s1060_s0 + $0x15] ss:$0 sm:$0xff] }
   0x9   :  { %v574_v19 = vld [vmem:[%s1060_s0 + $0x21] ss:$0 sm:$0xff]  ;;  %v578_v21 = vld [vmem:[%s1060_s0 + $0x5] ss:$0 sm:$0xff]  ;;  %v584_v22 = vld [vmem:[%s1060_s0 + $0x35] ss:$0 sm:$0xff] }
   0xa   :  { %40 = vbcast.lane.b32.xlu1 %v548_v4, 256  ;;  %v582_v23 = vld [vmem:[%s1060_s0 + $0x25] ss:$0 sm:$0xff]  ;;  %v588_v24 = vld [vmem:[%s1060_s0 + $0x19] ss:$0 sm:$0xff] }
   0xb   :  { %33 = vbcast.lane.b32.xlu0 %v546_v5, 256  ;;  %v586_v25 = vld [vmem:[%s1060_s0 + $0x9] ss:$0 sm:$0xff]  ;;  %v592_v26 = vld [vmem:[%s1060_s0 + $0x39] ss:$0 sm:$0xff] }
   0xc   :  { %v590_v27 = vld [vmem:[%s1060_s0 + $0x29] ss:$0 sm:$0xff]  ;;  %v596_v28 = vld [vmem:[%s1060_s0 + $0x1d] ss:$0 sm:$0xff]  ;;  %v594_v29 = vld [vmem:[%s1060_s0 + $0xd] ss:$0 sm:$0xff] }
   0xd   :  { %v600_v30 = vld [vmem:[%s1060_s0 + $0x3d] ss:$0 sm:$0xff]  ;;  %v598_v31 = vld [vmem:[%s1060_s0 + $0x2d] ss:$0 sm:$0xff]  ;;  %v604_v32 = vld [vmem:[%s1060_s0 + $0x12] ss:$0 sm:$0xff] }
   0xe   :  { %54 = vbcast.lane.b32.xlu1 %v552_v6, 256  ;;  %v602_v33 = vld [vmem:[%s1060_s0 + $0x2] ss:$0 sm:$0xff]  ;;  %v608_v34 = vld [vmem:[%s1060_s0 + $0x32] ss:$0 sm:$0xff] }
   0xf   :  { %47 = vbcast.lane.b32.xlu0 %v550_v7, 256  ;;  %v606_v35 = vld [vmem:[%s1060_s0 + $0x22] ss:$0 sm:$0xff]  ;;  %v612_v36 = vld [vmem:[%s1060_s0 + $0x16] ss:$0 sm:$0xff] }
  0x10   :  { %v610_v37 = vld [vmem:[%s1060_s0 + $0x6] ss:$0 sm:$0xff]  ;;  %v616_v38 = vld [vmem:[%s1060_s0 + $0x36] ss:$0 sm:$0xff]  ;;  %v620_v40 = vld [vmem:[%s1060_s0 + $0x1a] ss:$0 sm:$0xff] }
  0x11   :  { %v614_v39 = vld [vmem:[%s1060_s0 + $0x26] ss:$0 sm:$0xff]  ;;  %v618_v41 = vld [vmem:[%s1060_s0 + $0xa] ss:$0 sm:$0xff]  ;;  %v624_v42 = vld [vmem:[%s1060_s0 + $0x3a] ss:$0 sm:$0xff] }
  0x12   :  { %68 = vbcast.lane.b32.xlu1 %v556_v8, 256  ;;  %v622_v43 = vld [vmem:[%s1060_s0 + $0x2a] ss:$0 sm:$0xff]  ;;  %v628_v44 = vld [vmem:[%s1060_s0 + $0x1e] ss:$0 sm:$0xff] }
  0x13   :  { %61 = vbcast.lane.b32.xlu0 %v554_v9, 256  ;;  %v626_v45 = vld [vmem:[%s1060_s0 + $0xe] ss:$0 sm:$0xff]  ;;  %v632_v46 = vld [vmem:[%s1060_s0 + $0x3e] ss:$0 sm:$0xff] }
  0x14   :  { %v630_v47 = vld [vmem:[%s1060_s0 + $0x2e] ss:$0 sm:$0xff]  ;;  %v636_v48 = vld [vmem:[%s1060_s0 + $0x13] ss:$0 sm:$0xff]  ;;  %v634_v49 = vld [vmem:[%s1060_s0 + $0x3] ss:$0 sm:$0xff] }
  0x15   :  { %v640_v50 = vld [vmem:[%s1060_s0 + $0x33] ss:$0 sm:$0xff]  ;;  %v638_v51 = vld [vmem:[%s1060_s0 + $0x23] ss:$0 sm:$0xff]  ;;  %v644_v52 = vld [vmem:[%s1060_s0 + $0x17] ss:$0 sm:$0xff] }
  0x16   :  { %82 = vbcast.lane.b32.xlu1 %v560_v10, 256  ;;  %v642_v53 = vld [vmem:[%s1060_s0 + $0x7] ss:$0 sm:$0xff]  ;;  %v648_v54 = vld [vmem:[%s1060_s0 + $0x37] ss:$0 sm:$0xff] }
  0x17   :  { %75 = vbcast.lane.b32.xlu0 %v558_v11, 256  ;;  %v646_v55 = vld [vmem:[%s1060_s0 + $0x27] ss:$0 sm:$0xff]  ;;  %v652_v56 = vld [vmem:[%s1060_s0 + $0x1b] ss:$0 sm:$0xff] }
  0x18   :  { %v650_v57 = vld [vmem:[%s1060_s0 + $0xb] ss:$0 sm:$0xff]  ;;  %v656_v58 = vld [vmem:[%s1060_s0 + $0x3b] ss:$0 sm:$0xff]  ;;  %v660_v62 = vld [vmem:[%s1060_s0 + $0x1f] ss:$0 sm:$0xff] }
  0x19   :  { %v654_v59 = vld [vmem:[%s1060_s0 + $0x2b] ss:$0 sm:$0xff]  ;;  %v658_v63 = vld [vmem:[%s1060_s0 + $0xf] ss:$0 sm:$0xff]  ;;  %v664_v2 = vld [vmem:[%s1060_s0 + $0x3f] ss:$0 sm:$0xff] }
  0x1a   :  { %96 = vbcast.lane.b32.xlu1 %v564_v12, 256  ;;  %v662_v3 = vld [vmem:[%s1060_s0 + $0x2f] ss:$0 sm:$0xff] }
  0x1b   :  { %89 = vbcast.lane.b32.xlu0 %v562_v13, 256 }
  0x1e   :  { %110 = vbcast.lane.b32.xlu1 %v568_v14, 256 }
  0x1f   :  { %103 = vbcast.lane.b32.xlu0 %v566_v15, 256 }
  0x22   :  { %125 = vbcast.lane.b32.xlu1 %v572_v16, 256 }
  0x23   :  { %117 = vbcast.lane.b32.xlu0 %v570_v17, 256 }
  0x26   :  { %141 = vbcast.lane.b32.xlu1 %v576_v18, 256 }
  0x27   :  { %133 = vbcast.lane.b32.xlu0 %v574_v19, 256 }
  0x2a   :  { %157 = vbcast.lane.b32.xlu1 %v580_v20, 256 }
  0x2b   :  { %149 = vbcast.lane.b32.xlu0 %v578_v21, 256 }
  0x2e   :  { %173 = vbcast.lane.b32.xlu1 %v584_v22, 256 }
  0x2f   :  { %165 = vbcast.lane.b32.xlu0 %v582_v23, 256 }
  0x32   :  { %189 = vbcast.lane.b32.xlu1 %v588_v24, 256 }
  0x33   :  { %181 = vbcast.lane.b32.xlu0 %v586_v25, 256 }
  0x36   :  { %205 = vbcast.lane.b32.xlu1 %v592_v26, 256 }
  0x37   :  { %197 = vbcast.lane.b32.xlu0 %v590_v27, 256 }
  0x3a   :  { %221 = vbcast.lane.b32.xlu1 %v596_v28, 256 }
  0x3b   :  { %213 = vbcast.lane.b32.xlu0 %v594_v29, 256 }
  0x3e   :  { %237 = vbcast.lane.b32.xlu1 %v600_v30, 256 }
  0x3f   :  { %229 = vbcast.lane.b32.xlu0 %v598_v31, 256 }
  0x42   :  { %252 = vbcast.lane.b32.xlu1 %v604_v32, 256 }
  0x43   :  { %244 = vbcast.lane.b32.xlu0 %v602_v33, 256 }
  0x46   :  { %268 = vbcast.lane.b32.xlu1 %v608_v34, 256 }
  0x47   :  { %260 = vbcast.lane.b32.xlu0 %v606_v35, 256 }
  0x4a   :  { %284 = vbcast.lane.b32.xlu1 %v612_v36, 256 }
  0x4b   :  { %276 = vbcast.lane.b32.xlu0 %v610_v37, 256 }
  0x4e   :  { %300 = vbcast.lane.b32.xlu1 %v616_v38, 256 }
  0x4f   :  { %292 = vbcast.lane.b32.xlu0 %v614_v39, 256 }
  0x52   :  { %316 = vbcast.lane.b32.xlu1 %v620_v40, 256 }
  0x53   :  { %308 = vbcast.lane.b32.xlu0 %v618_v41, 256 }
  0x56   :  { %332 = vbcast.lane.b32.xlu1 %v624_v42, 256 }
  0x57   :  { %324 = vbcast.lane.b32.xlu0 %v622_v43, 256 }
  0x5a   :  { %348 = vbcast.lane.b32.xlu1 %v628_v44, 256 }
  0x5b   :  { %340 = vbcast.lane.b32.xlu0 %v626_v45, 256 }
  0x5e   :  { %364 = vbcast.lane.b32.xlu1 %v632_v46, 256 }
  0x5f   :  { %356 = vbcast.lane.b32.xlu0 %v630_v47, 256 }
  0x62   :  { %379 = vbcast.lane.b32.xlu1 %v636_v48, 256 }
  0x63   :  { %371 = vbcast.lane.b32.xlu0 %v634_v49, 256 }
  0x66   :  { %395 = vbcast.lane.b32.xlu1 %v640_v50, 256 }
  0x67   :  { %387 = vbcast.lane.b32.xlu0 %v638_v51, 256 }
  0x6a   :  { %411 = vbcast.lane.b32.xlu1 %v644_v52, 256 }
  0x6b   :  { %403 = vbcast.lane.b32.xlu0 %v642_v53, 256 }
  0x6e   :  { %427 = vbcast.lane.b32.xlu1 %v648_v54, 256 }
  0x6f   :  { %419 = vbcast.lane.b32.xlu0 %v646_v55, 256 }
  0x72   :  { %443 = vbcast.lane.b32.xlu1 %v652_v56, 256 }
  0x73   :  { %435 = vbcast.lane.b32.xlu0 %v650_v57, 256 }
  0x74   :  { %v20_v60 = vpop.permute.xlu1 %19 }
  0x75   :  { %v7_v61 = vpop.permute.xlu0 %6  ;;  %543 = vst [vmem:[%s1061_s1 + $0x80] sm:$0xf] %v20_v60 }
  0x76   :  { %8 = vst [vmem:[%s1061_s1] sm:$0xf] %v7_v61  ;;  %459 = vbcast.lane.b32.xlu1 %v656_v58, 256 }
  0x77   :  { %451 = vbcast.lane.b32.xlu0 %v654_v59, 256 }
  0x78   :  { %v27_v0 = vpop.permute.xlu1 %26 }
  0x79   :  { %v13_v1 = vpop.permute.xlu0 %12  ;;  %545 = vst [vmem:[%s1061_s1 + $0xc0] sm:$0xf] %v27_v0 }
  0x7a   :  { %541 = vst [vmem:[%s1061_s1 + $0x40] sm:$0xf] %v13_v1  ;;  %475 = vbcast.lane.b32.xlu1 %v660_v62, 256 }
  0x7b   :  { %467 = vbcast.lane.b32.xlu0 %v658_v63, 256 }
  0x7c   :  { %v41_v4 = vpop.permute.xlu1 %40 }
  0x7d   :  { %v34_v5 = vpop.permute.xlu0 %33  ;;  %549 = vst [vmem:[%s1061_s1 + $0x50] sm:$0xf] %v41_v4 }
  0x7e   :  { %547 = vst [vmem:[%s1061_s1 + $0x10] sm:$0xf] %v34_v5  ;;  %491 = vbcast.lane.b32.xlu1 %v664_v2, 256 }
  0x7f   :  { %483 = vbcast.lane.b32.xlu0 %v662_v3, 256 }
  0x80   :  { %v55_v6 = vpop.permute.xlu1 %54 }
  0x81   :  { %v48_v7 = vpop.permute.xlu0 %47  ;;  %553 = vst [vmem:[%s1061_s1 + $0xd0] sm:$0xf] %v55_v6 }
  0x82   :  { %551 = vst [vmem:[%s1061_s1 + $0x90] sm:$0xf] %v48_v7 }
  0x84   :  { %v69_v8 = vpop.permute.xlu1 %68 }
  0x85   :  { %v62_v9 = vpop.permute.xlu0 %61  ;;  %557 = vst [vmem:[%s1061_s1 + $0x60] sm:$0xf] %v69_v8 }
  0x86   :  { %555 = vst [vmem:[%s1061_s1 + $0x20] sm:$0xf] %v62_v9 }
  0x88   :  { %v83_v10 = vpop.permute.xlu1 %82 }
  0x89   :  { %v76_v11 = vpop.permute.xlu0 %75  ;;  %561 = vst [vmem:[%s1061_s1 + $0xe0] sm:$0xf] %v83_v10 }
  0x8a   :  { %559 = vst [vmem:[%s1061_s1 + $0xa0] sm:$0xf] %v76_v11 }
  0x8c   :  { %v97_v12 = vpop.permute.xlu1 %96 }
  0x8d   :  { %v90_v13 = vpop.permute.xlu0 %89  ;;  %565 = vst [vmem:[%s1061_s1 + $0x70] sm:$0xf] %v97_v12 }
  0x8e   :  { %563 = vst [vmem:[%s1061_s1 + $0x30] sm:$0xf] %v90_v13 }
  0x90   :  { %v111_v14 = vpop.permute.xlu1 %110 }
  0x91   :  { %v104_v15 = vpop.permute.xlu0 %103  ;;  %569 = vst [vmem:[%s1061_s1 + $0xf0] sm:$0xf] %v111_v14 }
  0x92   :  { %567 = vst [vmem:[%s1061_s1 + $0xb0] sm:$0xf] %v104_v15 }
  0x94   :  { %v126_v16 = vpop.permute.xlu1 %125 }
  0x95   :  { %v118_v17 = vpop.permute.xlu0 %117  ;;  %573 = vst [vmem:[%s1061_s1 + $0x44] sm:$0xf] %v126_v16 }
  0x96   :  { %571 = vst [vmem:[%s1061_s1 + $0x4] sm:$0xf] %v118_v17 }
  0x98   :  { %v142_v18 = vpop.permute.xlu1 %141 }
  0x99   :  { %v134_v19 = vpop.permute.xlu0 %133  ;;  %577 = vst [vmem:[%s1061_s1 + $0xc4] sm:$0xf] %v142_v18 }
  0x9a   :  { %575 = vst [vmem:[%s1061_s1 + $0x84] sm:$0xf] %v134_v19 }
  0x9c   :  { %v158_v20 = vpop.permute.xlu1 %157 }
  0x9d   :  { %v150_v21 = vpop.permute.xlu0 %149  ;;  %581 = vst [vmem:[%s1061_s1 + $0x54] sm:$0xf] %v158_v20 }
  0x9e   :  { %579 = vst [vmem:[%s1061_s1 + $0x14] sm:$0xf] %v150_v21 }
  0xa0   :  { %v174_v22 = vpop.permute.xlu1 %173 }
  0xa1   :  { %v166_v23 = vpop.permute.xlu0 %165  ;;  %585 = vst [vmem:[%s1061_s1 + $0xd4] sm:$0xf] %v174_v22 }
  0xa2   :  { %583 = vst [vmem:[%s1061_s1 + $0x94] sm:$0xf] %v166_v23 }
  0xa4   :  { %v190_v24 = vpop.permute.xlu1 %189 }
  0xa5   :  { %v182_v25 = vpop.permute.xlu0 %181  ;;  %589 = vst [vmem:[%s1061_s1 + $0x64] sm:$0xf] %v190_v24 }
  0xa6   :  { %587 = vst [vmem:[%s1061_s1 + $0x24] sm:$0xf] %v182_v25 }
  0xa8   :  { %v206_v26 = vpop.permute.xlu1 %205 }
  0xa9   :  { %v198_v27 = vpop.permute.xlu0 %197  ;;  %593 = vst [vmem:[%s1061_s1 + $0xe4] sm:$0xf] %v206_v26 }
  0xaa   :  { %591 = vst [vmem:[%s1061_s1 + $0xa4] sm:$0xf] %v198_v27 }
  0xac   :  { %v222_v28 = vpop.permute.xlu1 %221 }
  0xad   :  { %v214_v29 = vpop.permute.xlu0 %213  ;;  %597 = vst [vmem:[%s1061_s1 + $0x74] sm:$0xf] %v222_v28 }
  0xae   :  { %595 = vst [vmem:[%s1061_s1 + $0x34] sm:$0xf] %v214_v29 }
  0xb0   :  { %v238_v30 = vpop.permute.xlu1 %237 }
  0xb1   :  { %v230_v31 = vpop.permute.xlu0 %229  ;;  %601 = vst [vmem:[%s1061_s1 + $0xf4] sm:$0xf] %v238_v30 }
  0xb2   :  { %599 = vst [vmem:[%s1061_s1 + $0xb4] sm:$0xf] %v230_v31 }
  0xb4   :  { %v253_v32 = vpop.permute.xlu1 %252 }
  0xb5   :  { %v245_v33 = vpop.permute.xlu0 %244  ;;  %605 = vst [vmem:[%s1061_s1 + $0x48] sm:$0xf] %v253_v32 }
  0xb6   :  { %603 = vst [vmem:[%s1061_s1 + $0x8] sm:$0xf] %v245_v33 }
  0xb8   :  { %v269_v34 = vpop.permute.xlu1 %268 }
  0xb9   :  { %v261_v35 = vpop.permute.xlu0 %260  ;;  %609 = vst [vmem:[%s1061_s1 + $0xc8] sm:$0xf] %v269_v34 }
  0xba   :  { %607 = vst [vmem:[%s1061_s1 + $0x88] sm:$0xf] %v261_v35 }
  0xbc   :  { %v285_v36 = vpop.permute.xlu1 %284 }
  0xbd   :  { %v277_v37 = vpop.permute.xlu0 %276  ;;  %613 = vst [vmem:[%s1061_s1 + $0x58] sm:$0xf] %v285_v36 }
  0xbe   :  { %611 = vst [vmem:[%s1061_s1 + $0x18] sm:$0xf] %v277_v37 }
  0xc0   :  { %v301_v38 = vpop.permute.xlu1 %300 }
  0xc1   :  { %v293_v39 = vpop.permute.xlu0 %292  ;;  %617 = vst [vmem:[%s1061_s1 + $0xd8] sm:$0xf] %v301_v38 }
  0xc2   :  { %615 = vst [vmem:[%s1061_s1 + $0x98] sm:$0xf] %v293_v39 }
  0xc4   :  { %v317_v40 = vpop.permute.xlu1 %316 }
  0xc5   :  { %v309_v41 = vpop.permute.xlu0 %308  ;;  %621 = vst [vmem:[%s1061_s1 + $0x68] sm:$0xf] %v317_v40 }
  0xc6   :  { %619 = vst [vmem:[%s1061_s1 + $0x28] sm:$0xf] %v309_v41 }
  0xc8   :  { %v333_v42 = vpop.permute.xlu1 %332 }
  0xc9   :  { %v325_v43 = vpop.permute.xlu0 %324  ;;  %625 = vst [vmem:[%s1061_s1 + $0xe8] sm:$0xf] %v333_v42 }
  0xca   :  { %623 = vst [vmem:[%s1061_s1 + $0xa8] sm:$0xf] %v325_v43 }
  0xcc   :  { %v349_v44 = vpop.permute.xlu1 %348 }
  0xcd   :  { %v341_v45 = vpop.permute.xlu0 %340  ;;  %629 = vst [vmem:[%s1061_s1 + $0x78] sm:$0xf] %v349_v44 }
  0xce   :  { %627 = vst [vmem:[%s1061_s1 + $0x38] sm:$0xf] %v341_v45 }
  0xd0   :  { %v365_v46 = vpop.permute.xlu1 %364 }
  0xd1   :  { %v357_v47 = vpop.permute.xlu0 %356  ;;  %633 = vst [vmem:[%s1061_s1 + $0xf8] sm:$0xf] %v365_v46 }
  0xd2   :  { %631 = vst [vmem:[%s1061_s1 + $0xb8] sm:$0xf] %v357_v47 }
  0xd4   :  { %v380_v48 = vpop.permute.xlu1 %379 }
  0xd5   :  { %v372_v49 = vpop.permute.xlu0 %371  ;;  %637 = vst [vmem:[%s1061_s1 + $0x4c] sm:$0xf] %v380_v48 }
  0xd6   :  { %635 = vst [vmem:[%s1061_s1 + $0xc] sm:$0xf] %v372_v49 }
  0xd8   :  { %v396_v50 = vpop.permute.xlu1 %395 }
  0xd9   :  { %v388_v51 = vpop.permute.xlu0 %387  ;;  %641 = vst [vmem:[%s1061_s1 + $0xcc] sm:$0xf] %v396_v50 }
  0xda   :  { %639 = vst [vmem:[%s1061_s1 + $0x8c] sm:$0xf] %v388_v51 }
  0xdc   :  { %v412_v52 = vpop.permute.xlu1 %411 }
  0xdd   :  { %v404_v53 = vpop.permute.xlu0 %403  ;;  %645 = vst [vmem:[%s1061_s1 + $0x5c] sm:$0xf] %v412_v52 }
  0xde   :  { %643 = vst [vmem:[%s1061_s1 + $0x1c] sm:$0xf] %v404_v53 }
  0xe0   :  { %v428_v54 = vpop.permute.xlu1 %427 }
  0xe1   :  { %v420_v55 = vpop.permute.xlu0 %419  ;;  %649 = vst [vmem:[%s1061_s1 + $0xdc] sm:$0xf] %v428_v54 }
  0xe2   :  { %647 = vst [vmem:[%s1061_s1 + $0x9c] sm:$0xf] %v420_v55 }
  0xe4   :  { %v444_v56 = vpop.permute.xlu1 %443 }
  0xe5   :  { %v436_v57 = vpop.permute.xlu0 %435  ;;  %653 = vst [vmem:[%s1061_s1 + $0x6c] sm:$0xf] %v444_v56 }
  0xe6   :  { %651 = vst [vmem:[%s1061_s1 + $0x2c] sm:$0xf] %v436_v57 }
  0xe8   :  { %v460_v58 = vpop.permute.xlu1 %459 }
  0xe9   :  { %v452_v59 = vpop.permute.xlu0 %451  ;;  %657 = vst [vmem:[%s1061_s1 + $0xec] sm:$0xf] %v460_v58 }
  0xea   :  { %655 = vst [vmem:[%s1061_s1 + $0xac] sm:$0xf] %v452_v59 }
  0xec   :  { %v476_v60 = vpop.permute.xlu1 %475 }
  0xed   :  { %v468_v61 = vpop.permute.xlu0 %467  ;;  %661 = vst [vmem:[%s1061_s1 + $0x7c] sm:$0xf] %v476_v60 }
  0xee   :  { %659 = vst [vmem:[%s1061_s1 + $0x3c] sm:$0xf] %v468_v61 }
  0xf0   :  { %v492_v62 = vpop.permute.xlu1 %491 }
  0xf1   :  { %v484_v63 = vpop.permute.xlu0 %483  ;;  %665 = vst [vmem:[%s1061_s1 + $0xfc] sm:$0xf] %v492_v62 }
  0xf2   :  { %663 = vst [vmem:[%s1061_s1 + $0xbc] sm:$0xf] %v484_v63 }

// kernel: aed2_forward.1
= control target key start
LH: loop header
LB: loop body
LE: loop exit
PB: predicated region body
PF: predicated region fallthrough
CT: control target
= control target key end

     0   :  { %s3634_s18 = smov 0   ;;  %s4744_s0 = inlined_call_operand.vmem [shape: f32[256,16], index: 0, kind: input, shape index: {}]   ;;  %s4745_s1 = inlined_call_operand.vmem [shape: f32[16,32], index: 1, kind: input, shape index: {}]   ;;  %s4746_s2 = inlined_call_operand.vmem [shape: f32[1,32], index: 2, kind: input, shape index: {}]   ;;  %s4747_s3 = inlined_call_operand.vmem [shape: f32[32,4], index: 3, kind: input, shape index: {}]   ;;  %s4748_s4 = inlined_call_operand.vmem [shape: f32[1,4], index: 4, kind: input, shape index: {}]   ;;  %s4749_s5 = inlined_call_operand.vmem [shape: f32[4,32], index: 5, kind: input, shape index: {}]   ;;  %s4750_s6 = inlined_call_operand.vmem [shape: f32[1,32], index: 6, kind: input, shape index: {}]   ;;  %s4751_s7 = inlined_call_operand.vmem [shape: f32[4,32], index: 7, kind: input, shape index: {}]   ;;  %s4752_s8 = inlined_call_operand.vmem [shape: f32[1,32], index: 8, kind: input, shape index: {}]   ;;  %s4753_s9 = inlined_call_operand.vmem [shape: f32[32,640], index: 9, kind: input, shape index: {}]   ;;  %s4754_s10 = inlined_call_operand.vmem [shape: f32[256,128], index: 10, kind: input, shape index: {}]   ;;  %s4755_s11 = inlined_call_operand.vmem [shape: f32[32,256], index: 11, kind: input, shape index: {}]   ;;  %s4756_s12 = inlined_call_operand.vmem [shape: f32[1,256], index: 12, kind: input, shape index: {}]   ;;  %s4757_s13 = inlined_call_operand.vmem [shape: f32[128,160], index: 13, kind: input, shape index: {}]   ;;  %s4758_s14 = inlined_call_operand.vmem [shape: f32[32,128], index: 14, kind: input, shape index: {}]   ;;  %s4759_s15 = inlined_call_operand.vmem [shape: f32[256,128], index: 15, kind: output, shape index: {}]  }
   0x1 LB: > { %s2911_s19 = sadd.s32 4294967295, %s3551_s18   ;;  %p2915_p0 = scmp.ge.s32.totalorder %s3551_s18, 1  ;;  %s3551_s18 = sphi %s3634_s18, %s25_s18  }
   0x2   : > { %p438_p1 = scmp.lt.s32.totalorder %s3551_s18, 3 }
   0x4   : > { %p439_p2 = pnand %p2915_p0, %p438_p1 }
   0x6   : > { %442 = sbr.rel (%p439_p2) target bundleno = 1425 (0x591), region = 80 }
   0xb   : > { %v515_v0 = vld [vmem:[%s4745_s1 + $0x8] sm:$0xff]  ;;  %v514_v1 = vld [vmem:[%s4745_s1] sm:$0xff]  ;;  %s2916_s24 = sshll.u32 %s2911_s19, 4  ;;  %vm523_vm0 = vcmask 130048   ;;  %v736_v18 = vld [vmem:[%s4747_s3 + $0x18] sm:$0xff]  ;;  %vm995_vm1 = vcmask 1043456  }
   0xc   : > { %3264 = vmatprep.subr.mxu0 %v515_v0  ;;  %p487_p3 = scmp.lt.s32.totalorder %s2916_s24, 31  ;;  %3292 = vmatprep.subr.mxu1 %v736_v18  ;;  %v735_v19 = vld [vmem:[%s4747_s3 + $0x10] sm:$0xff]  ;;  %v734_v20 = vld [vmem:[%s4747_s3 + $0x8] sm:$0xff]  ;;  %v733_v21 = vld [vmem:[%s4747_s3] sm:$0xff]  ;;  %vm744_vm2 = vcmask 261120   ;;  %vm946_vm3 = vcmask 31744  }
   0xd   : > { %3265 = vmatpush3.msra.mxu0 %v515_v0  ;;  %3293 = vmatpush3.msra.mxu1 %v736_v18  ;;  %v938_v22 = vld [vmem:[%s4749_s5] sm:$0xf] }
   0xe   : > { %3266 = vmatprep.subr.mxu0 %v514_v1  ;;  %s4810_s24 = smov (!%p487_p3, %s2916_s24), 31  ;;  %3294 = vmatprep.subr.mxu1 %v735_v19  ;;  %v2920_v23 = vld [vmem:[%s4746_s2] ss:$0 sm:$0xff] }
   0xf   : > { %3267 = vmatpush3.msra.mxu0 %v514_v1  ;;  %s2917_s25 = sshll.u32 %s4810_s24, 3  ;;  %3295 = vmatpush3.msra.mxu1 %v735_v19 }
  0x10   : > { %s3656_s28 = scalar_lea.vmem %s4744_s0, %s2917_s25  ;;  %3296 = vmatprep.subr.mxu1 %v734_v20  ;;  %3324 = vmatprep.subr.msk.mxu0 %vm995_vm1, %v938_v22  ;;  %s4710_s29 = scalar_lea.vmem %s4759_s15, %s2917_s25 }
  0x11   : > { %v498_v2 = vld [vmem:[%s3656_s28] sm:$0xff]  ;;  %v499_v3 = vld [vmem:[%s3656_s28 + $0x8] sm:$0xff]  ;;  %v500_v4 = vld [vmem:[%s3656_s28 + $0x10] sm:$0xff]  ;;  %3297 = vmatpush3.msra.mxu1 %v734_v20 }
  0x12   : > { %3268 = vmatprep.mubr.msk.f32.mxu0 %vm523_vm0, %v498_v2  ;;  %v501_v5 = vld [vmem:[%s3656_s28 + $0x18] sm:$0xff]  ;;  %v502_v6 = vld [vmem:[%s3656_s28 + $0x20] sm:$0xff]  ;;  %v503_v7 = vld [vmem:[%s3656_s28 + $0x28] sm:$0xff]  ;;  %3298 = vmatprep.subr.mxu1 %v733_v21 }
  0x13   : > { %3269 = vmatmul.mubr.msk.f32.vlgmr.msra.gmra.mxu0 %vm523_vm0, %v499_v3  ;;  %v504_v8 = vld [vmem:[%s3656_s28 + $0x30] sm:$0xff]  ;;  %v505_v9 = vld [vmem:[%s3656_s28 + $0x38] sm:$0xff]  ;;  %v506_v10 = vld [vmem:[%s3656_s28 + $0x40] sm:$0xff]  ;;  %3299 = vmatpush3.msra.mxu1 %v733_v21 }
  0x14   : > { %3271 = vmatprep.mubr.msk.f32.mxu0 %vm523_vm0, %v500_v4  ;;  %v507_v11 = vld [vmem:[%s3656_s28 + $0x48] sm:$0xff]  ;;  %v508_v12 = vld [vmem:[%s3656_s28 + $0x50] sm:$0xff]  ;;  %v509_v13 = vld [vmem:[%s3656_s28 + $0x58] sm:$0xff]  ;;  %3325 = vmatpush3.msk.msra.mxu0 %vm995_vm1, %v938_v22 }
  0x15   : > { %v510_v14 = vld [vmem:[%s3656_s28 + $0x60] sm:$0xff]  ;;  %v511_v15 = vld [vmem:[%s3656_s28 + $0x68] sm:$0xff]  ;;  %v512_v16 = vld [vmem:[%s3656_s28 + $0x70] sm:$0xff] }
  0x16   : > { %v513_v17 = vld [vmem:[%s3656_s28 + $0x78] sm:$0xff]  ;;  %v1406_v22 = vld [vmem:[%s4753_s9 + $0x50] sm:$0xff] }
  0x17   : > { %3272 = vmatmul.mubr.msk.f32.gmra.mxu0 %vm523_vm0, %v501_v5 }
  0x18   : > { %3274 = vmatprep.mubr.msk.f32.mxu0 %vm523_vm0, %v502_v6 }
  0x1b   : > { %3275 = vmatmul.mubr.msk.f32.gmra.mxu0 %vm523_vm0, %v503_v7 }
  0x1c   : > { %3277 = vmatprep.mubr.msk.f32.mxu0 %vm523_vm0, %v504_v8  ;;  %v1160_v8 = vld [vmem:[%s4751_s7] sm:$0xf] }
  0x1d   : > { %3350 = vmatprep.subr.msk.mxu1 %vm995_vm1, %v1160_v8 }
  0x1f   : > { %3278 = vmatmul.mubr.msk.f32.gmra.mxu0 %vm523_vm0, %v505_v9  ;;  %v1412_v9 = vld [vmem:[%s4753_s9 + $0x80] sm:$0xff] }
  0x20   : > { %3280 = vmatprep.mubr.msk.f32.mxu0 %vm523_vm0, %v506_v10  ;;  %1488 = vmatprep.subr.mxu0 %v1412_v9 }
  0x23   : > { %3281 = vmatmul.mubr.msk.f32.gmra.mxu0 %vm523_vm0, %v507_v11  ;;  %v3737_v11 = vld [vmem:[%s4748_s4] ss:$0 sm:$0xff] }
  0x24   : > { %3283 = vmatprep.mubr.msk.f32.mxu0 %vm523_vm0, %v508_v12 }
  0x27   : > { %3284 = vmatmul.mubr.msk.f32.gmra.mxu0 %vm523_vm0, %v509_v13 }
  0x28   : > { %3286 = vmatprep.mubr.msk.f32.mxu0 %vm523_vm0, %v510_v14 }
  0x2b   : > { %3287 = vmatmul.mubr.msk.f32.gmra.mxu0 %vm523_vm0, %v511_v15 }
  0x2c   : > { %3289 = vmatprep.mubr.msk.f32.mxu0 %vm523_vm0, %v512_v16  ;;  %v1411_v16 = vld [vmem:[%s4753_s9 + $0x78] sm:$0xff] }
  0x2f   : > { %3290 = vmatmul.mubr.msk.f32.gmra.mxu0 %vm523_vm0, %v513_v17  ;;  %v1407_v17 = vld [vmem:[%s4753_s9 + $0x58] sm:$0xff] }
  0xd3   : > { %v3270_v24 = vpop.f32.mrf.mxu0 }
  0xd4   : > { %v644_v25 = vadd.f32 %v3270_v24, %v2920_v23 }
  0xd5   : > { %v638_v26 = vpop.f32.mrf.mxu0 }
  0xd6   : > { %v639_v27 = vadd.f32 %v2920_v23, %v638_v26 }
  0xd7   : > { %v3273_v28 = vpop.f32.mrf.mxu0 }
  0xd8   : > { %3449 = vtanh.f32 %v639_v27  ;;  %v654_v29 = vadd.f32 %v3273_v28, %v2920_v23 }
  0xd9   : > { %3451 = vtanh.f32 %v644_v25  ;;  %v648_v30 = vpop.f32.mrf.mxu0 }
  0xda   : > { %v649_v31 = vadd.f32 %v2920_v23, %v648_v30  ;;  %3453 = vtanh.f32 %v654_v29 }
  0xdb   : > { %v3276_v32 = vpop.f32.mrf.mxu0 }
  0xdc   : > { %3455 = vtanh.f32 %v649_v31  ;;  %v664_v33 = vadd.f32 %v3276_v32, %v2920_v23 }
  0xdd   : > { %v658_v34 = vpop.f32.mrf.mxu0 }
  0xde   : > { %v659_v35 = vadd.f32 %v2920_v23, %v658_v34  ;;  %3457 = vtanh.f32 %v664_v33 }
  0xdf   : > { %v3279_v36 = vpop.f32.mrf.mxu0 }
  0xe0   : > { %3459 = vtanh.f32 %v659_v35  ;;  %v674_v37 = vadd.f32 %v3279_v36, %v2920_v23 }
  0xe1   : > { %v668_v38 = vpop.f32.mrf.mxu0 }
  0xe2   : > { %v669_v39 = vadd.f32 %v2920_v23, %v668_v38  ;;  %3461 = vtanh.f32 %v674_v37 }
  0xe3   : > { %v3282_v40 = vpop.f32.mrf.mxu0 }
  0xe4   : > { %3463 = vtanh.f32 %v669_v39  ;;  %v684_v41 = vadd.f32 %v3282_v40, %v2920_v23 }
  0xe5   : > { %v3450_v42 = vpop.eup %3449  ;;  %v678_v43 = vpop.f32.mrf.mxu0 }
  0xe6   : > { %v3452_v44 = vpop.eup %3451  ;;  %3300 = vmatprep.mubr.msk.f32.mxu1 %vm744_vm2, %v3450_v42  ;;  %v679_v45 = vadd.f32 %v2920_v23, %v678_v43  ;;  %3465 = vtanh.f32 %v684_v41 }
  0xe7   : > { %3301 = vmatmul.mubr.msk.f32.vlgmr.msra.gmra.mxu1 %vm744_vm2, %v3452_v44  ;;  %v3285_v46 = vpop.f32.mrf.mxu0  ;;  %v3454_v47 = vpop.eup %3453 }
  0xe8   : > { %3467 = vtanh.f32 %v679_v45  ;;  %v694_v48 = vadd.f32 %v3285_v46, %v2920_v23  ;;  %3351 = vmatpush3.msk.msra.mxu1 %vm995_vm1, %v1160_v8  ;;  %v1414_v46 = vld [vmem:[%s4753_s9 + $0x90] sm:$0xff] }
  0xe9   : > { %v3456_v49 = vpop.eup %3455  ;;  %v688_v50 = vpop.f32.mrf.mxu0  ;;  %1649 = vmatprep.subr.mxu1 %v1414_v46 }
  0xea   : > { %3303 = vmatprep.mubr.msk.f32.mxu1 %vm744_vm2, %v3456_v49  ;;  %v689_v51 = vadd.f32 %v2920_v23, %v688_v50  ;;  %3469 = vtanh.f32 %v694_v48  ;;  %v1409_v48 = vld [vmem:[%s4753_s9 + $0x68] sm:$0xff]  ;;  %v1408_v49 = vld [vmem:[%s4753_s9 + $0x60] sm:$0xff]  ;;  %v1402_v50 = vld [vmem:[%s4753_s9 + $0x30] sm:$0xff] }
  0xeb   : > { %3304 = vmatmul.mubr.msk.f32.gmra.mxu1 %vm744_vm2, %v3454_v47  ;;  %v3288_v52 = vpop.f32.mrf.mxu0  ;;  %v3458_v53 = vpop.eup %3457  ;;  %v1413_v47 = vld [vmem:[%s4753_s9 + $0x88] sm:$0xff] }
  0xec   : > { %3471 = vtanh.f32 %v689_v51  ;;  %v704_v54 = vadd.f32 %v3288_v52, %v2920_v23  ;;  %v1404_v51 = vld [vmem:[%s4753_s9 + $0x40] sm:$0xff]  ;;  %v1401_v52 = vld [vmem:[%s4753_s9 + $0x28] sm:$0xff] }
  0xed   : > { %v3460_v55 = vpop.eup %3459  ;;  %v698_v56 = vpop.f32.mrf.mxu0 }
  0xee   : > { %3306 = vmatprep.mubr.msk.f32.mxu1 %vm744_vm2, %v3460_v55  ;;  %v699_v57 = vadd.f32 %v2920_v23, %v698_v56  ;;  %3473 = vtanh.f32 %v704_v54  ;;  %v1397_v54 = vld [vmem:[%s4753_s9 + $0x8] sm:$0xff]  ;;  %v1396_v55 = vld [vmem:[%s4753_s9] sm:$0xff]  ;;  %v1399_v56 = vld [vmem:[%s4753_s9 + $0x18] sm:$0xff] }
  0xef   : > { %3307 = vmatmul.mubr.msk.f32.gmra.mxu1 %vm744_vm2, %v3458_v53  ;;  %v3291_v58 = vpop.f32.mrf.mxu0  ;;  %v3462_v59 = vpop.eup %3461  ;;  %v1403_v53 = vld [vmem:[%s4753_s9 + $0x38] sm:$0xff] }
  0xf0   : > { %3475 = vtanh.f32 %v699_v57  ;;  %v714_v60 = vadd.f32 %v3291_v58, %v2920_v23  ;;  %v1398_v57 = vld [vmem:[%s4753_s9 + $0x10] sm:$0xff]  ;;  %v1415_v58 = vld [vmem:[%s4753_s9 + $0x98] sm:$0xff] }
  0xf1   : > { %v3464_v61 = vpop.eup %3463  ;;  %v708_v62 = vpop.f32.mrf.mxu0 }
  0xf2   : > { %3309 = vmatprep.mubr.msk.f32.mxu1 %vm744_vm2, %v3464_v61  ;;  %v709_v63 = vadd.f32 %v2920_v23, %v708_v62  ;;  %3477 = vtanh.f32 %v714_v60  ;;  %v3840_v60 = vld [vmem:[%s4750_s6] ss:$0 sm:$0xff] }
  0xf3   : > { %3310 = vmatmul.mubr.msk.f32.gmra.mxu1 %vm744_vm2, %v3462_v59  ;;  %v3466_v0 = vpop.eup %3465  ;;  %v4760_v59 = vmov 0.0  }
  0xf4   : > { %3479 = vtanh.f32 %v709_v63 }
  0xf5   : > { %v3468_v1 = vpop.eup %3467 }
  0xf6   : > { %3312 = vmatprep.mubr.msk.f32.mxu1 %vm744_vm2, %v3468_v1 }
  0xf7   : > { %3313 = vmatmul.mubr.msk.f32.gmra.mxu1 %vm744_vm2, %v3466_v0  ;;  %v3470_v2 = vpop.eup %3469 }
  0xf9   : > { %v3472_v3 = vpop.eup %3471 }
  0xfa   : > { %3315 = vmatprep.mubr.msk.f32.mxu1 %vm744_vm2, %v3472_v3 }
  0xfb   : > { %3316 = vmatmul.mubr.msk.f32.gmra.mxu1 %vm744_vm2, %v3470_v2  ;;  %v3474_v4 = vpop.eup %3473 }
  0xfd   : > { %v3476_v5 = vpop.eup %3475 }
  0xfe   : > { %3318 = vmatprep.mubr.msk.f32.mxu1 %vm744_vm2, %v3476_v5 }
  0xff   : > { %3319 = vmatmul.mubr.msk.f32.gmra.mxu1 %vm744_vm2, %v3474_v4  ;;  %v3478_v6 = vpop.eup %3477 }
 0x101   : > { %v3480_v7 = vpop.eup %3479 }
 0x102   : > { %3321 = vmatprep.mubr.msk.f32.mxu1 %vm744_vm2, %v3480_v7 }
 0x103   : > { %3322 = vmatmul.mubr.msk.f32.gmra.mxu1 %vm744_vm2, %v3478_v6 }
 0x1a7   : > { %v3302_v10 = vpop.f32.mrf.mxu1 }
 0x1a8   : > { %v865_v14 = vadd.f32 %v3302_v10, %v3737_v11 }
 0x1a9   : > { %v859_v12 = vpop.f32.mrf.mxu1 }
 0x1aa   : > { %v860_v13 = vadd.f32 %v3737_v11, %v859_v12 }
 0x1ab   : > { %v3305_v15 = vpop.f32.mrf.mxu1 }
 0x1ac   : > { %3326 = vmatprep.mubr.msk.f32.mxu0 %vm946_vm3, %v860_v13  ;;  %3352 = vmatprep.mubr.msk.f32.mxu1 %vm946_vm3, %v860_v13  ;;  %v875_v20 = vadd.f32 %v3305_v15, %v3737_v11 }
 0x1ad   : > { %v869_v18 = vpop.f32.mrf.mxu1  ;;  %3327 = vmatmul.mubr.msk.f32.vlgmr.msra.gmra.mxu0 %vm946_vm3, %v865_v14  ;;  %3353 = vmatmul.mubr.msk.f32.vlgmr.msra.gmra.mxu1 %vm946_vm3, %v865_v14 }
 0x1ae   : > { %v870_v19 = vadd.f32 %v3737_v11, %v869_v18  ;;  %1489 = vmatpush1.msra.mxu0 %v1411_v16  ;;  %1650 = vmatpush1.msra.mxu1 %v1413_v47 }
 0x1af   : > { %v3308_v21 = vpop.f32.mrf.mxu1  ;;  %1490 = vmatprep.subr.mxu0 %v1407_v17  ;;  %1651 = vmatprep.subr.mxu1 %v1409_v48 }
 0x1b0   : > { %3329 = vmatprep.mubr.msk.f32.mxu0 %vm946_vm3, %v870_v19  ;;  %3355 = vmatprep.mubr.msk.f32.mxu1 %vm946_vm3, %v870_v19  ;;  %v885_v23 = vadd.f32 %v3308_v21, %v3737_v11 }
 0x1b1   : > { %v879_v24 = vpop.f32.mrf.mxu1  ;;  %3330 = vmatmul.mubr.msk.f32.gmra.mxu0 %vm946_vm3, %v875_v20  ;;  %3356 = vmatmul.mubr.msk.f32.gmra.mxu1 %vm946_vm3, %v875_v20 }
 0x1b2   : > { %v880_v25 = vadd.f32 %v3737_v11, %v879_v24  ;;  %1491 = vmatpush1.msra.mxu0 %v1406_v22  ;;  %1652 = vmatpush1.msra.mxu1 %v1408_v49 }
 0x1b3   : > { %v3311_v26 = vpop.f32.mrf.mxu1  ;;  %1492 = vmatprep.subr.mxu0 %v1402_v50  ;;  %1653 = vmatprep.subr.mxu1 %v1404_v51 }
 0x1b4   : > { %3332 = vmatprep.mubr.msk.f32.mxu0 %vm946_vm3, %v880_v25  ;;  %3358 = vmatprep.mubr.msk.f32.mxu1 %vm946_vm3, %v880_v25  ;;  %v895_v27 = vadd.f32 %v3311_v26, %v3737_v11 }
 0x1b5   : > { %3333 = vmatmul.mubr.msk.f32.gmra.mxu0 %vm946_vm3, %v885_v23  ;;  %3359 = vmatmul.mubr.msk.f32.gmra.mxu1 %vm946_vm3, %v885_v23  ;;  %v889_v28 = vpop.f32.mrf.mxu1  ;;  %v1410_v23 = vld [vmem:[%s4753_s9 + $0x70] sm:$0xff] }
 0x1b6   : > { %v890_v29 = vadd.f32 %v3737_v11, %v889_v28  ;;  %1493 = vmatpush1.msra.mxu0 %v1401_v52  ;;  %1654 = vmatpush1.msra.mxu1 %v1403_v53 }
 0x1b7   : > { %v3314_v30 = vpop.f32.mrf.mxu1  ;;  %1494 = vmatprep.subr.mxu0 %v1397_v54  ;;  %1655 = vmatprep.subr.mxu1 %v1399_v56  ;;  %v2163_v56 = vld [vmem:[%s4755_s11 + $0x38] sm:$0xff] }
 0x1b8   : > { %3335 = vmatprep.mubr.msk.f32.mxu0 %vm946_vm3, %v890_v29  ;;  %3361 = vmatprep.mubr.msk.f32.mxu1 %vm946_vm3, %v890_v29  ;;  %v905_v31 = vadd.f32 %v3314_v30, %v3737_v11 }
 0x1b9   : > { %3336 = vmatmul.mubr.msk.f32.gmra.mxu0 %vm946_vm3, %v895_v27  ;;  %3362 = vmatmul.mubr.msk.f32.gmra.mxu1 %vm946_vm3, %v895_v27  ;;  %v899_v32 = vpop.f32.mrf.mxu1 }
 0x1ba   : > { %v900_v33 = vadd.f32 %v3737_v11, %v899_v32  ;;  %1495 = vmatpush1.msra.mxu0 %v1396_v55  ;;  %1656 = vmatpush1.msra.mxu1 %v1398_v57 }
 0x1bb   : > { %v3317_v34 = vpop.f32.mrf.mxu1  ;;  %3376 = vmatprep.subr.mxu0 %v1415_v58 }
 0x1bc   : > { %3338 = vmatprep.mubr.msk.f32.mxu0 %vm946_vm3, %v900_v33  ;;  %3364 = vmatprep.mubr.msk.f32.mxu1 %vm946_vm3, %v900_v33  ;;  %v915_v35 = vadd.f32 %v3317_v34, %v3737_v11 }
 0x1bd   : > { %3339 = vmatmul.mubr.msk.f32.gmra.mxu0 %vm946_vm3, %v905_v31  ;;  %3365 = vmatmul.mubr.msk.f32.gmra.mxu1 %vm946_vm3, %v905_v31  ;;  %v909_v36 = vpop.f32.mrf.mxu1 }
 0x1be   : > { %v910_v37 = vadd.f32 %v3737_v11, %v909_v36 }
 0x1bf   : > { %v3320_v38 = vpop.f32.mrf.mxu1 }
 0x1c0   : > { %3341 = vmatprep.mubr.msk.f32.mxu0 %vm946_vm3, %v910_v37  ;;  %3367 = vmatprep.mubr.msk.f32.mxu1 %vm946_vm3, %v910_v37  ;;  %v925_v39 = vadd.f32 %v3320_v38, %v3737_v11 }
 0x1c1   : > { %3342 = vmatmul.mubr.msk.f32.gmra.mxu0 %vm946_vm3, %v915_v35  ;;  %3368 = vmatmul.mubr.msk.f32.gmra.mxu1 %vm946_vm3, %v915_v35  ;;  %v919_v40 = vpop.f32.mrf.mxu1  ;;  %v1405_v35 = vld [vmem:[%s4753_s9 + $0x48] sm:$0xff] }
 0x1c2   : > { %v920_v41 = vadd.f32 %v3737_v11, %v919_v40 }
 0x1c3   : > { %v3323_v42 = vpop.f32.mrf.mxu1 }
 0x1c4   : > { %3344 = vmatprep.mubr.msk.f32.mxu0 %vm946_vm3, %v920_v41  ;;  %3370 = vmatprep.mubr.msk.f32.mxu1 %vm946_vm3, %v920_v41  ;;  %v935_v43 = vadd.f32 %v3323_v42, %v3737_v11 }
 0x1c5   : > { %3345 = vmatmul.mubr.msk.f32.gmra.mxu0 %vm946_vm3, %v925_v39  ;;  %3371 = vmatmul.mubr.msk.f32.gmra.mxu1 %vm946_vm3, %v925_v39  ;;  %v929_v44 = vpop.f32.mrf.mxu1 }
 0x1c6   : > { %v930_v45 = vadd.f32 %v3737_v11, %v929_v44 }
 0x1c8   : > { %3347 = vmatprep.mubr.msk.f32.mxu0 %vm946_vm3, %v930_v45  ;;  %3373 = vmatprep.mubr.msk.f32.mxu1 %vm946_vm3, %v930_v45  ;;  %v1400_v45 = vld [vmem:[%s4753_s9 + $0x20] sm:$0xff] }
 0x1c9   : > { %3348 = vmatmul.mubr.msk.f32.gmra.mxu0 %vm946_vm3, %v935_v43  ;;  %3374 = vmatmul.mubr.msk.f32.gmra.mxu1 %vm946_vm3, %v935_v43 }
 0x1ca   : > { %1528 = vmatprep.mubr.f32.mxu0 %v4760_v59  ;;  %1689 = vmatprep.mubr.f32.mxu1 %v4760_v59 }
 0x26d   : > { %v3328_v61 = vpop.f32.mrf.mxu0 }
 0x26e   : > { %v1071_v62 = vadd.f32 %v3328_v61, %v3840_v60 }
 0x26f   : > { %v1065_v63 = vpop.f32.mrf.mxu0 }
 0x270   : > { %v1066_v0 = vadd.f32 %v3840_v60, %v1065_v63  ;;  %3481 = vtanh.f32 %v1071_v62 }
 0x271   : > { %v3331_v1 = vpop.f32.mrf.mxu0 }
 0x272   : > { %3483 = vtanh.f32 %v1066_v0  ;;  %v1081_v4 = vadd.f32 %v3331_v1, %v3840_v60 }
 0x273   : > { %v1075_v2 = vpop.f32.mrf.mxu0 }
 0x274   : > { %v1076_v3 = vadd.f32 %v3840_v60, %v1075_v2 }
 0x275   : > { %v3334_v5 = vpop.f32.mrf.mxu0 }
 0x276   : > { %3485 = vtanh.f32 %v1076_v3  ;;  %v1091_v11 = vadd.f32 %v3334_v5, %v3840_v60 }
 0x277   : > { %v1085_v6 = vpop.f32.mrf.mxu0  ;;  %3487 = vtanh.f32 %v1081_v4 }
 0x278   : > { %v1086_v7 = vadd.f32 %v3840_v60, %v1085_v6 }
 0x279   : > { %v3337_v8 = vpop.f32.mrf.mxu0 }
 0x27a   : > { %3489 = vtanh.f32 %v1086_v7  ;;  %v1101_v27 = vadd.f32 %v3337_v8, %v3840_v60 }
 0x27b   : > { %v1095_v9 = vpop.f32.mrf.mxu0 }
 0x27c   : > { %v1096_v10 = vadd.f32 %v3840_v60, %v1095_v9 }
 0x27d   : > { %v3849_v12 = vpop.f32.mrf.mxu0  ;;  %v3851_v13 = vpop.eup %3481 }
 0x27e   : > { %3491 = vtanh.f32 %v1096_v10  ;;  %v1333_v20 = vmul.f32 %v3851_v13, %v3851_v13  ;;  %v1111_v52 = vadd.f32 %v3849_v12, %v3840_v60 }
 0x27f   : > { %v3484_v14 = vpop.eup %3483  ;;  %v1105_v15 = vpop.f32.mrf.mxu0  ;;  %3493 = vtanh.f32 %v1091_v11 }
 0x280   : > { %v1332_v16 = vmul.f32 %v3484_v14, %v3484_v14  ;;  %v1106_v17 = vadd.f32 %v3840_v60, %v1105_v15  ;;  %v1364_v24 = vmul.f32 -2.0, %v3484_v14  ;;  %v3878_v31 = vsub.f32 1.0, %v1333_v20 }
 0x281   : > { %v3854_v18 = vpop.f32.mrf.mxu0 }
 0x282   : > { %v3856_v19 = vsub.f32 1.0, %v1332_v16  ;;  %3495 = vtanh.f32 %v1106_v17  ;;  %v1121_v5 = vadd.f32 %v3854_v18, %v3840_v60 }
 0x283   : > { %v3486_v21 = vpop.eup %3485  ;;  %v1115_v22 = vpop.f32.mrf.mxu0 }
 0x284   : > { %2990 = vmatmul.mubr.msk.f32.vlgmr.msra.gmra.mxu0 %vm744_vm2, %v3856_v19  ;;  %3006 = vmatmul.mubr.msk.f32.vlgmr.msra.gmra.mxu1 %vm744_vm2, %v3856_v19  ;;  %v1334_v25 = vmul.f32 %v3486_v21, %v3486_v21  ;;  %v1116_v26 = vadd.f32 %v3840_v60, %v1115_v22  ;;  %v3873_v29 = vmul.f32 %v1364_v24, %v3856_v19  ;;  %v3875_v30 = vpop.eup %3487  ;;  %v1366_v36 = vmul.f32 -2.0, %v3486_v21 }
 0x285   : > { %3377 = vmatpush3.msra.mxu0 %v1415_v58  ;;  %1534 = vmatprep.mubr.f32.mxu0 %v4760_v59  ;;  %v3870_v28 = vpop.f32.mrf.mxu0  ;;  %v1335_v41 = vmul.f32 %v3875_v30, %v3875_v30 }
 0x286   : > { %1695 = vmatprep.mubr.f32.mxu1 %v4760_v59  ;;  %v3880_v32 = vsub.f32 1.0, %v1334_v25  ;;  %3497 = vtanh.f32 %v1116_v26  ;;  %3378 = vmatprep.subr.mxu0 %v1410_v23  ;;  %v1131_v20 = vadd.f32 %v3870_v28, %v3840_v60 }
 0x287   : > { %v3490_v33 = vpop.eup %3489  ;;  %3379 = vmatpush3.msra.mxu0 %v1410_v23  ;;  %v1125_v34 = vpop.f32.mrf.mxu0  ;;  %3499 = vtanh.f32 %v1101_v27  ;;  %v3918_v53 = vsub.f32 1.0, %v1335_v41  ;;  %v2162_v41 = vld [vmem:[%s4755_s11 + $0x30] sm:$0xff] }
 0x288   : > { %2991 = vmatmul.mubr.msk.f32.gmra.mxu0 %vm744_vm2, %v3878_v31  ;;  %3007 = vmatmul.mubr.msk.f32.gmra.mxu1 %vm744_vm2, %v3878_v31  ;;  %v1336_v37 = vmul.f32 %v3490_v33, %v3490_v33  ;;  %v1126_v38 = vadd.f32 %v3840_v60, %v1125_v34  ;;  %v3895_v40 = vmul.f32 %v1366_v36, %v3880_v32  ;;  %v1368_v46 = vmul.f32 -2.0, %v3490_v33 }
 0x289   : > { %1540 = vmatprep.mubr.f32.mxu0 %v4760_v59  ;;  %1701 = vmatprep.mubr.f32.mxu1 %v4760_v59  ;;  %v3892_v39 = vpop.f32.mrf.mxu0 }
 0x28a   : > { %v3899_v42 = vsub.f32 1.0, %v1336_v37  ;;  %3501 = vtanh.f32 %v1126_v38  ;;  %3380 = vmatprep.subr.mxu0 %v1405_v35  ;;  %v1141_v26 = vadd.f32 %v3892_v39, %v3840_v60 }
 0x28b   : > { %v3492_v43 = vpop.eup %3491  ;;  %v1135_v44 = vpop.f32.mrf.mxu0  ;;  %3381 = vmatpush3.msra.mxu0 %v1405_v35 }
 0x28c   : > { %2992 = vmatmul.mubr.msk.f32.gmra.mxu0 %vm744_vm2, %v3880_v32  ;;  %3008 = vmatmul.mubr.msk.f32.gmra.mxu1 %vm744_vm2, %v3880_v32  ;;  %v1338_v47 = vmul.f32 %v3492_v43, %v3492_v43  ;;  %v1136_v48 = vadd.f32 %v3840_v60, %v1135_v44  ;;  %v3912_v49 = vmul.f32 %v1368_v46, %v3899_v42  ;;  %v1370_v50 = vmul.f32 -2.0, %v3492_v43  ;;  %v3914_v51 = vpop.eup %3493  ;;  %v2161_v43 = vld [vmem:[%s4755_s11 + $0x28] sm:$0xff]  ;;  %v2160_v44 = vld [vmem:[%s4755_s11 + $0x20] sm:$0xff] }
 0x28d   : > { %1546 = vmatprep.mubr.f32.mxu0 %v4760_v59  ;;  %1707 = vmatprep.mubr.f32.mxu1 %v4760_v59  ;;  %v1337_v62 = vmul.f32 %v3914_v51, %v3914_v51  ;;  %v2157_v46 = vld [vmem:[%s4755_s11 + $0x8] sm:$0xff] }
 0x28e   : > { %v3920_v54 = vsub.f32 1.0, %v1338_v47  ;;  %3503 = vtanh.f32 %v1136_v48  ;;  %3382 = vmatprep.subr.mxu0 %v1400_v45  ;;  %v1994_v47 = vld [vmem:[%s4754_s10 + $0xf8] sm:$0xff]  ;;  %v3354_v48 = vpop.f32.mrf.mxu1 }
 0x28f   : > { %v3496_v55 = vpop.eup %3495  ;;  %3383 = vmatpush3.msra.mxu0 %v1400_v45  ;;  %3505 = vtanh.f32 %v1111_v52  ;;  %v3951_v6 = vsub.f32 1.0, %v1337_v62  ;;  %v2158_v45 = vld [vmem:[%s4755_s11 + $0x10] sm:$0xff]  ;;  %3164 = vmatprep.subr.mxu1 %v1994_v47  ;;  %v1976_v62 = vld [vmem:[%s4754_s10 + $0x68] sm:$0xff] }
 0x290   : > { %2993 = vmatmul.mubr.msk.f32.gmra.mxu0 %vm744_vm2, %v3918_v53  ;;  %3009 = vmatmul.mubr.msk.f32.gmra.mxu1 %vm744_vm2, %v3918_v53  ;;  %v1340_v57 = vmul.f32 %v3496_v55, %v3496_v55  ;;  %v3930_v58 = vmul.f32 %v1370_v50, %v3920_v54  ;;  %v1372_v61 = vmul.f32 -2.0, %v3496_v55  ;;  %3507 = vtanh.f32 %v1121_v5  ;;  %v1978_v50 = vld [vmem:[%s4754_s10 + $0x78] sm:$0xff]  ;;  %v1993_v52 = vld [vmem:[%s4754_s10 + $0xf0] sm:$0xff] }
 0x291   : > { %1552 = vmatprep.mubr.f32.mxu0 %v4760_v59  ;;  %1713 = vmatprep.mubr.f32.mxu1 %v4760_v59  ;;  %3509 = vtanh.f32 %v1131_v20  ;;  %v1977_v55 = vld [vmem:[%s4754_s10 + $0x70] sm:$0xff]  ;;  %v1990_v5 = vld [vmem:[%s4754_s10 + $0xd8] sm:$0xff] }
 0x292   : > { %v3936_v63 = vsub.f32 1.0, %v1340_v57  ;;  %2248 = vmatprep.subr.mxu0 %v2163_v56  ;;  %3511 = vtanh.f32 %v1141_v26  ;;  %3165 = vmatpush3.msra.mxu1 %v1978_v50  ;;  %v1992_v56 = vld [vmem:[%s4754_s10 + $0xe8] sm:$0xff]  ;;  %v4119_v57 = vld [vmem:[%s4752_s8] ss:$0 sm:$0xff] }
 0x293   : > { %v3498_v0 = vpop.eup %3497  ;;  %3166 = vmatprep.subr.mxu1 %v1993_v52  ;;  %v1987_v26 = vld [vmem:[%s4754_s10 + $0xc0] sm:$0xff]  ;;  %v1969_v52 = vld [vmem:[%s4754_s10 + $0x30] sm:$0xff] }
 0x294   : > { %2994 = vmatmul.mubr.msk.f32.gmra.mxu0 %vm744_vm2, %v3899_v42  ;;  %3010 = vmatmul.mubr.msk.f32.gmra.mxu1 %vm744_vm2, %v3899_v42  ;;  %v1342_v1 = vmul.f32 %v3498_v0, %v3498_v0  ;;  %v3943_v2 = vmul.f32 %v1372_v61, %v3936_v63  ;;  %v1374_v3 = vmul.f32 -2.0, %v3498_v0  ;;  %v3947_v4 = vpop.eup %3499  ;;  %v1991_v0 = vld [vmem:[%s4754_s10 + $0xe0] sm:$0xff] }
 0x295   : > { %1558 = vmatprep.mubr.f32.mxu0 %v4760_v59  ;;  %1719 = vmatprep.mubr.f32.mxu1 %v4760_v59  ;;  %v1339_v12 = vmul.f32 %v3947_v4, %v3947_v4 }
 0x296   : > { %4770 = vst [vmem:[#allocation2_spill] sm:$0xff] %v3943_v2  ;;  %v3953_v7 = vsub.f32 1.0, %v1342_v1  ;;  %3167 = vmatpush3.msra.mxu1 %v1977_v55 }
 0x297   : > { %v3502_v8 = vpop.eup %3501  ;;  %v3979_v21 = vsub.f32 1.0, %v1339_v12  ;;  %3168 = vmatprep.subr.mxu1 %v1992_v56 }
 0x298   : > { %2995 = vmatmul.mubr.msk.f32.gmra.mxu0 %vm744_vm2, %v3951_v6  ;;  %3011 = vmatmul.mubr.msk.f32.gmra.mxu1 %vm744_vm2, %v3951_v6  ;;  %v1344_v9 = vmul.f32 %v3502_v8, %v3502_v8  ;;  %v3960_v10 = vmul.f32 %v1374_v3, %v3953_v7  ;;  %v1376_v11 = vmul.f32 -2.0, %v3502_v8  ;;  %v1975_v3 = vld [vmem:[%s4754_s10 + $0x60] sm:$0xff] }
 0x299   : > { %1564 = vmatprep.mubr.f32.mxu0 %v4760_v59  ;;  %1725 = vmatprep.mubr.f32.mxu1 %v4760_v59 }
 0x29a   : > { %4771 = vst [vmem:[#allocation3_spill] sm:$0xff] %v3960_v10  ;;  %v3966_v14 = vsub.f32 1.0, %v1344_v9  ;;  %3169 = vmatpush3.msra.mxu1 %v1976_v62  ;;  %v1974_v9 = vld [vmem:[%s4754_s10 + $0x58] sm:$0xff]  ;;  %v1983_v62 = vld [vmem:[%s4754_s10 + $0xa0] sm:$0xff] }
 0x29b   : > { %v3504_v15 = vpop.eup %3503  ;;  %3170 = vmatprep.subr.mxu1 %v1991_v0 }
 0x29c   : > { %2996 = vmatmul.mubr.msk.f32.gmra.mxu0 %vm744_vm2, %v3920_v54  ;;  %3012 = vmatmul.mubr.msk.f32.gmra.mxu1 %vm744_vm2, %v3920_v54  ;;  %v1346_v16 = vmul.f32 %v3504_v15, %v3504_v15  ;;  %v3973_v17 = vmul.f32 %v1376_v11, %v3966_v14  ;;  %v1378_v18 = vmul.f32 -2.0, %v3504_v15  ;;  %v3983_v23 = vpop.eup %3505  ;;  %v1989_v11 = vld [vmem:[%s4754_s10 + $0xd0] sm:$0xff] }
 0x29d   : > { %1570 = vmatprep.mubr.f32.mxu0 %v4760_v59  ;;  %1731 = vmatprep.mubr.f32.mxu1 %v4760_v59  ;;  %4773 = vst [vmem:[#allocation5_spill] sm:$0xff] %v3983_v23  ;;  %v1341_v25 = vmul.f32 %v3983_v23, %v3983_v23  ;;  %v4006_v28 = vpop.eup %3507  ;;  %v1973_v15 = vld [vmem:[%s4754_s10 + $0x50] sm:$0xff] }
 0x29e   : > { %4772 = vst [vmem:[#allocation4_spill] sm:$0xff] %v3973_v17  ;;  %v3981_v22 = vsub.f32 1.0, %v1346_v16  ;;  %4776 = vst [vmem:[#allocation8_spill] sm:$0xff] %v4006_v28  ;;  %v1343_v33 = vmul.f32 %v4006_v28, %v4006_v28  ;;  %v4024_v34 = vpop.eup %3509  ;;  %3171 = vmatpush3.msra.mxu1 %v1975_v3  ;;  %v1988_v16 = vld [vmem:[%s4754_s10 + $0xc8] sm:$0xff]  ;;  %v1967_v3 = vld [vmem:[%s4754_s10 + $0x20] sm:$0xff] }
 0x29f   : > { %v4004_v27 = vsub.f32 1.0, %v1341_v25  ;;  %4778 = vst [vmem:[#allocation10_spill] sm:$0xff] %v4024_v34  ;;  %v1345_v35 = vmul.f32 %v4024_v34, %v4024_v34  ;;  %v4042_v37 = vpop.eup %3511  ;;  %3172 = vmatprep.subr.mxu1 %v1990_v5  ;;  %v1972_v25 = vld [vmem:[%s4754_s10 + $0x48] sm:$0xff]  ;;  %v1982_v5 = vld [vmem:[%s4754_s10 + $0x98] sm:$0xff] }
 0x2a0   : > { %2997 = vmatmul.mubr.msk.f32.gmra.mxu0 %vm744_vm2, %v3979_v21  ;;  %3013 = vmatmul.mubr.msk.f32.gmra.mxu1 %vm744_vm2, %v3979_v21  ;;  %v3990_v24 = vmul.f32 %v1378_v18, %v3981_v22  ;;  %v4022_v60 = vsub.f32 1.0, %v1343_v33  ;;  %4780 = vst [vmem:[#allocation12_spill] sm:$0xff] %v4042_v37  ;;  %v1347_v38 = vmul.f32 %v4042_v37, %v4042_v37 }
 0x2a1   : > { %1576 = vmatprep.mubr.f32.mxu0 %v4760_v59  ;;  %1737 = vmatprep.mubr.f32.mxu1 %v4760_v59  ;;  %4775 = vst [vmem:[#allocation7_spill] sm:$0xff] %v4004_v27  ;;  %v4040_v36 = vsub.f32 1.0, %v1345_v35 }
 0x2a2   : > { %4774 = vst [vmem:[#allocation6_spill] sm:$0xff] %v3990_v24  ;;  %4777 = vst [vmem:[#allocation9_spill] sm:$0xff] %v4022_v60  ;;  %v4058_v39 = vsub.f32 1.0, %v1347_v38  ;;  %3173 = vmatpush3.msra.mxu1 %v1974_v9 }
 0x2a3   : > { %4779 = vst [vmem:[#allocation11_spill] sm:$0xff] %v4040_v36  ;;  %3174 = vmatprep.subr.mxu1 %v1989_v11  ;;  %v1966_v11 = vld [vmem:[%s4754_s10 + $0x18] sm:$0xff] }
 0x2a4   : > { %2998 = vmatmul.mubr.msk.f32.gmra.mxu0 %vm744_vm2, %v3936_v63  ;;  %3014 = vmatmul.mubr.msk.f32.gmra.mxu1 %vm744_vm2, %v3936_v63  ;;  %4781 = vst [vmem:[#allocation13_spill] sm:$0xff] %v4058_v39 }
 0x2a5   : > { %1582 = vmatprep.mubr.f32.mxu0 %v4760_v59  ;;  %1743 = vmatprep.mubr.f32.mxu1 %v4760_v59 }
 0x2a6   : > { %3175 = vmatpush3.msra.mxu1 %v1973_v15 }
 0x2a7   : > { %3176 = vmatprep.subr.mxu1 %v1988_v16 }
 0x2a8   : > { %2999 = vmatmul.mubr.msk.f32.gmra.mxu0 %vm744_vm2, %v4004_v27  ;;  %3015 = vmatmul.mubr.msk.f32.gmra.mxu1 %vm744_vm2, %v4004_v27 }
 0x2a9   : > { %1588 = vmatprep.mubr.f32.mxu0 %v4760_v59  ;;  %1749 = vmatprep.mubr.f32.mxu1 %v4760_v59 }
 0x2aa   : > { %3177 = vmatpush3.msra.mxu1 %v1972_v25 }
 0x2ab   : > { %3178 = vmatprep.subr.mxu1 %v1987_v26 }
 0x2ac   : > { %3000 = vmatmul.mubr.msk.f32.gmra.mxu0 %vm744_vm2, %v3953_v7  ;;  %3016 = vmatmul.mubr.msk.f32.gmra.mxu1 %vm744_vm2, %v3953_v7 }
 0x2ad   : > { %1594 = vmatprep.mubr.f32.mxu0 %v4760_v59  ;;  %1755 = vmatprep.mubr.f32.mxu1 %v4760_v59 }
 0x2b0   : > { %3001 = vmatmul.mubr.msk.f32.gmra.mxu0 %vm744_vm2, %v4022_v60  ;;  %3017 = vmatmul.mubr.msk.f32.gmra.mxu1 %vm744_vm2, %v4022_v60 }
 0x2b1   : > { %1600 = vmatprep.mubr.f32.mxu0 %v4760_v59  ;;  %1761 = vmatprep.mubr.f32.mxu1 %v4760_v59 }
 0x2b4   : > { %3002 = vmatmul.mubr.msk.f32.gmra.mxu0 %vm744_vm2, %v3966_v14  ;;  %3018 = vmatmul.mubr.msk.f32.gmra.mxu1 %vm744_vm2, %v3966_v14 }
 0x2b5   : > { %1606 = vmatprep.mubr.f32.mxu0 %v4760_v59  ;;  %1767 = vmatprep.mubr.f32.mxu1 %v4760_v59 }
 0x2b8   : > { %3003 = vmatmul.mubr.msk.f32.gmra.mxu0 %vm744_vm2, %v4040_v36  ;;  %3019 = vmatmul.mubr.msk.f32.gmra.mxu1 %vm744_vm2, %v4040_v36 }
 0x2b9   : > { %1612 = vmatprep.mubr.f32.mxu0 %v4760_v59  ;;  %1773 = vmatprep.mubr.f32.mxu1 %v4760_v59 }
 0x2bc   : > { %3004 = vmatmul.mubr.msk.f32.gmra.mxu0 %vm744_vm2, %v3981_v22  ;;  %3020 = vmatmul.mubr.msk.f32.gmra.mxu1 %vm744_vm2, %v3981_v22 }
 0x2bd   : > { %1618 = vmatprep.mubr.f32.mxu0 %v4760_v59  ;;  %1779 = vmatprep.mubr.f32.mxu1 %v4760_v59 }
 0x2c0   : > { %3005 = vmatmul.mubr.msk.f32.gmra.mxu0 %vm744_vm2, %v4058_v39  ;;  %3021 = vmatmul.mubr.msk.f32.gmra.mxu1 %vm744_vm2, %v4058_v39 }
 0x2c1   : > { %3384 = vmatprep.mubr.msk.f32.mxu0 %vm744_vm2, %v3856_v19  ;;  %v2159_v19 = vld [vmem:[%s4755_s11 + $0x18] sm:$0xff] }
 0x2c4   : > { %3385 = vmatmul.mubr.msk.f32.vlgmr.msra.gmra.mxu0 %vm744_vm2, %v3878_v31 }
 0x2c5   : > { %3387 = vmatprep.mubr.msk.f32.mxu0 %vm744_vm2, %v3880_v32  ;;  %2249 = vmatpush1.msra.mxu0 %v2162_v41  ;;  %v2156_v32 = vld [vmem:[%s4755_s11] sm:$0xff] }
 0x2c6   : > { %2250 = vmatprep.subr.mxu0 %v2161_v43  ;;  %v1971_v41 = vld [vmem:[%s4754_s10 + $0x40] sm:$0xff]  ;;  %v1986_v43 = vld [vmem:[%s4754_s10 + $0xb8] sm:$0xff] }
 0x2c7   : > { %2251 = vmatpush1.msra.mxu0 %v2160_v44  ;;  %3179 = vmatpush3.msra.mxu1 %v1971_v41 }
 0x2c8   : > { %3388 = vmatmul.mubr.msk.f32.gmra.mxu0 %vm744_vm2, %v3918_v53  ;;  %2252 = vmatprep.subr.mxu0 %v2159_v19 }
 0x2c9   : > { %3390 = vmatprep.mubr.msk.f32.mxu0 %vm744_vm2, %v3899_v42  ;;  %2253 = vmatpush1.msra.mxu0 %v2158_v45  ;;  %v1237_v42 = vpop.f32.mrf.mxu1 }
 0x2ca   : > { %2254 = vmatprep.subr.mxu0 %v2157_v46  ;;  %3180 = vmatprep.subr.mxu1 %v1986_v43  ;;  %v1970_v46 = vld [vmem:[%s4754_s10 + $0x38] sm:$0xff] }
 0x2cb   : > { %2255 = vmatpush1.msra.mxu0 %v2156_v32  ;;  %v3357_v61 = vpop.f32.mrf.mxu1  ;;  %3181 = vmatpush3.msra.mxu1 %v1970_v46  ;;  %v1985_v32 = vld [vmem:[%s4754_s10 + $0xb0] sm:$0xff] }
 0x2cc   : > { %3391 = vmatmul.mubr.msk.f32.gmra.mxu0 %vm744_vm2, %v3951_v6  ;;  %v1253_v12 = vadd.f32 %v3357_v61, %v4119_v57  ;;  %3182 = vmatprep.subr.mxu1 %v1985_v32  ;;  %v1968_v61 = vld [vmem:[%s4754_s10 + $0x28] sm:$0xff] }
 0x2cd   : > { %3393 = vmatprep.mubr.msk.f32.mxu0 %vm744_vm2, %v3920_v54  ;;  %v1238_v54 = vadd.f32 %v4119_v57, %v1237_v42  ;;  %v1247_v1 = vpop.f32.mrf.mxu1  ;;  %3183 = vmatpush3.msra.mxu1 %v1969_v52  ;;  %v1984_v42 = vld [vmem:[%s4754_s10 + $0xa8] sm:$0xff] }
 0x2ce   : > { %3184 = vmatprep.subr.mxu1 %v1984_v42 }
 0x2cf   : > { %3513 = vtanh.f32 %v1238_v54  ;;  %v3360_v8 = vpop.f32.mrf.mxu1  ;;  %3185 = vmatpush3.msra.mxu1 %v1968_v61 }
 0x2d0   : > { %3394 = vmatmul.mubr.msk.f32.gmra.mxu0 %vm744_vm2, %v3979_v21  ;;  %v1263_v33 = vadd.f32 %v3360_v8, %v4119_v57  ;;  %3186 = vmatprep.subr.mxu1 %v1983_v62 }
 0x2d1   : > { %3396 = vmatprep.mubr.msk.f32.mxu0 %vm744_vm2, %v3936_v63  ;;  %v1243_v63 = vadd.f32 %v3354_v48, %v4119_v57  ;;  %3187 = vmatpush3.msra.mxu1 %v1967_v3 }
 0x2d2   : > { %3188 = vmatprep.subr.mxu1 %v1982_v5 }
 0x2d3   : > { %3515 = vtanh.f32 %v1243_v63  ;;  %3189 = vmatpush3.msra.mxu1 %v1966_v11 }
 0x2d4   : > { %3397 = vmatmul.mubr.msk.f32.gmra.mxu0 %vm744_vm2, %v4004_v27 }
 0x2d5   : > { %3399 = vmatprep.mubr.msk.f32.mxu0 %vm744_vm2, %v3953_v7  ;;  %v1248_v7 = vadd.f32 %v4119_v57, %v1247_v1 }
 0x2d7   : > { %3517 = vtanh.f32 %v1248_v7 }
 0x2d8   : > { %3400 = vmatmul.mubr.msk.f32.gmra.mxu0 %vm744_vm2, %v4022_v60  ;;  %3519 = vtanh.f32 %v1253_v12  ;;  %v1981_v12 = vld [vmem:[%s4754_s10 + $0x90] sm:$0xff] }
 0x2d9   : > { %3402 = vmatprep.mubr.msk.f32.mxu0 %vm744_vm2, %v3966_v14  ;;  %v1257_v14 = vpop.f32.mrf.mxu1  ;;  %3190 = vmatprep.subr.mxu1 %v1981_v12 }
 0x2da   : > { %v1258_v18 = vadd.f32 %v4119_v57, %v1257_v14 }
 0x2dc   : > { %3403 = vmatmul.mubr.msk.f32.gmra.mxu0 %vm744_vm2, %v4040_v36  ;;  %v3514_v20 = vpop.eup %3513  ;;  %3521 = vtanh.f32 %v1258_v18  ;;  %v1965_v18 = vld [vmem:[%s4754_s10 + $0x10] sm:$0xff] }
 0x2dd   : > { %3405 = vmatprep.mubr.msk.f32.mxu0 %vm744_vm2, %v3981_v22  ;;  %v3363_v22 = vpop.f32.mrf.mxu1  ;;  %3523 = vtanh.f32 %v1263_v33  ;;  %3191 = vmatpush3.msra.mxu1 %v1965_v18  ;;  %v1964_v33 = vld [vmem:[%s4754_s10 + $0x8] sm:$0xff] }
 0x2de   : > { %v1273_v47 = vadd.f32 %v3363_v22, %v4119_v57 }
 0x2df   : > { %v1267_v38 = vpop.f32.mrf.mxu1 }
 0x2e0   : > { %3406 = vmatmul.mubr.msk.f32.gmra.mxu0 %vm744_vm2, %v4058_v39  ;;  %v3516_v35 = vpop.eup %3515  ;;  %v1268_v44 = vadd.f32 %v4119_v57, %v1267_v38 }
 0x2e1   : > { %2288 = vmatprep.mubr.f32.mxu0 %v4760_v59  ;;  %v3366_v45 = vpop.f32.mrf.mxu1 }
 0x2e2   : > { %3525 = vtanh.f32 %v1268_v44  ;;  %v1283_v0 = vadd.f32 %v3366_v45, %v4119_v57  ;;  %v1963_v44 = vld [vmem:[%s4754_s10] sm:$0xff] }
 0x2e3   : > { %v1277_v50 = vpop.f32.mrf.mxu1  ;;  %3527 = vtanh.f32 %v1273_v47 }
 0x2e4   : > { %3038 = vmatmul.mubr.msk.f32.vlgmr.msra.gmra.mxu0 %vm744_vm2, %v3514_v20  ;;  %v3518_v19 = vpop.eup %3517  ;;  %v1278_v55 = vadd.f32 %v4119_v57, %v1277_v50  ;;  %v1980_v20 = vld [vmem:[%s4754_s10 + $0x88] sm:$0xff] }
 0x2e5   : > { %2294 = vmatprep.mubr.f32.mxu0 %v4760_v59  ;;  %v3520_v48 = vpop.eup %3519  ;;  %v3369_v54 = vpop.f32.mrf.mxu1  ;;  %3192 = vmatprep.subr.mxu1 %v1980_v20 }
 0x2e6   : > { %3529 = vtanh.f32 %v1278_v55  ;;  %v1293_v14 = vadd.f32 %v3369_v54, %v4119_v57  ;;  %3193 = vmatpush3.msra.mxu1 %v1964_v33 }
 0x2e7   : > { %v1287_v1 = vpop.f32.mrf.mxu1  ;;  %3531 = vtanh.f32 %v1283_v0 }
 0x2e8   : > { %3039 = vmatmul.mubr.msk.f32.gmra.mxu0 %vm744_vm2, %v3516_v35  ;;  %v1288_v7 = vadd.f32 %v4119_v57, %v1287_v1  ;;  %v1979_v35 = vld [vmem:[%s4754_s10 + $0x80] sm:$0xff] }
 0x2e9   : > { %2300 = vmatprep.mubr.f32.mxu0 %v4760_v59  ;;  %v3522_v56 = vpop.eup %3521  ;;  %v3372_v9 = vpop.f32.mrf.mxu1  ;;  %3194 = vmatprep.subr.mxu1 %v1979_v35 }
 0x2ea   : > { %v3524_v63 = vpop.eup %3523  ;;  %3533 = vtanh.f32 %v1288_v7  ;;  %v1303_v38 = vadd.f32 %v3372_v9, %v4119_v57  ;;  %3195 = vmatpush3.msra.mxu1 %v1963_v44 }
 0x2eb   : > { %v1297_v16 = vpop.f32.mrf.mxu1  ;;  %3535 = vtanh.f32 %v1293_v14 }
 0x2ec   : > { %3040 = vmatmul.mubr.msk.f32.gmra.mxu0 %vm744_vm2, %v3518_v19  ;;  %v1298_v22 = vadd.f32 %v4119_v57, %v1297_v16  ;;  %v2432_v19 = vld [vmem:[%s4757_s13 + $0xf8] sm:$0xff] }
 0x2ed   : > { %2306 = vmatprep.mubr.f32.mxu0 %v4760_v59  ;;  %v3375_v26 = vpop.f32.mrf.mxu1  ;;  %2433 = vmatprep.subr.mxu1 %v2432_v19 }
 0x2ee   : > { %3537 = vtanh.f32 %v1298_v22  ;;  %v1313_v32 = vadd.f32 %v3375_v26, %v4119_v57 }
 0x2ef   : > { %v3526_v8 = vpop.eup %3525  ;;  %v1307_v43 = vpop.f32.mrf.mxu1  ;;  %3539 = vtanh.f32 %v1303_v38 }
 0x2f0   : > { %3041 = vmatmul.mubr.msk.f32.gmra.mxu0 %vm744_vm2, %v3520_v48  ;;  %v3528_v15 = vpop.eup %3527  ;;  %v1308_v45 = vadd.f32 %v4119_v57, %v1307_v43 }
 0x2f1   : > { %2312 = vmatprep.mubr.f32.mxu0 %v4760_v59 }
 0x2f2   : > { %3541 = vtanh.f32 %v1308_v45 }
 0x2f3   : > { %v3530_v25 = vpop.eup %3529  ;;  %3543 = vtanh.f32 %v1313_v32 }
 0x2f4   : > { %3042 = vmatmul.mubr.msk.f32.gmra.mxu0 %vm744_vm2, %v3522_v56  ;;  %v3532_v41 = vpop.eup %3531 }
 0x2f5   : > { %2318 = vmatprep.mubr.f32.mxu0 %v4760_v59 }
 0x2f7   : > { %v3534_v46 = vpop.eup %3533 }
 0x2f8   : > { %3043 = vmatmul.mubr.msk.f32.gmra.mxu0 %vm744_vm2, %v3524_v63  ;;  %v3536_v47 = vpop.eup %3535 }
 0x2f9   : > { %2324 = vmatprep.mubr.f32.mxu0 %v4760_v59 }
 0x2fb   : > { %v3538_v48 = vpop.eup %3537 }
 0x2fc   : > { %3044 = vmatmul.mubr.msk.f32.gmra.mxu0 %vm744_vm2, %v3526_v8  ;;  %v3540_v50 = vpop.eup %3539 }
 0x2fd   : > { %2330 = vmatprep.mubr.f32.mxu0 %v4760_v59 }
 0x2ff   : > { %v3542_v52 = vpop.eup %3541 }
 0x300   : > { %3045 = vmatmul.mubr.msk.f32.gmra.mxu0 %vm744_vm2, %v3528_v15  ;;  %v3544_v57 = vpop.eup %3543 }
 0x301   : > { %2336 = vmatprep.mubr.f32.mxu0 %v4760_v59 }
 0x304   : > { %3046 = vmatmul.mubr.msk.f32.gmra.mxu0 %vm744_vm2, %v3530_v25 }
 0x305   : > { %2342 = vmatprep.mubr.f32.mxu0 %v4760_v59 }
 0x308   : > { %3047 = vmatmul.mubr.msk.f32.gmra.mxu0 %vm744_vm2, %v3532_v41 }
 0x309   : > { %2348 = vmatprep.mubr.f32.mxu0 %v4760_v59 }
 0x30c   : > { %3048 = vmatmul.mubr.msk.f32.gmra.mxu0 %vm744_vm2, %v3534_v46 }
 0x30d   : > { %2354 = vmatprep.mubr.f32.mxu0 %v4760_v59 }
 0x310   : > { %3049 = vmatmul.mubr.msk.f32.gmra.mxu0 %vm744_vm2, %v3536_v47 }
 0x311   : > { %2360 = vmatprep.mubr.f32.mxu0 %v4760_v59 }
 0x314   : > { %3050 = vmatmul.mubr.msk.f32.gmra.mxu0 %vm744_vm2, %v3538_v48 }
 0x315   : > { %2366 = vmatprep.mubr.f32.mxu0 %v4760_v59 }
 0x318   : > { %3051 = vmatmul.mubr.msk.f32.gmra.mxu0 %vm744_vm2, %v3540_v50 }
 0x319   : > { %2372 = vmatprep.mubr.f32.mxu0 %v4760_v59 }
 0x31c   : > { %3052 = vmatmul.mubr.msk.f32.gmra.mxu0 %vm744_vm2, %v3542_v52 }
 0x31d   : > { %2378 = vmatprep.mubr.f32.mxu0 %v4760_v59 }
 0x320   : > { %3053 = vmatmul.mubr.msk.f32.gmra.mxu0 %vm744_vm2, %v3544_v57 }
 0x344   : > { %v4269_v42 = vpop.f32.mrf.mxu0  ;;  %v1691_v55 = vpop.f32.mrf.mxu1 }
 0x346   : > { %v1532_v56 = vpop.f32.mrf.mxu0  ;;  %v1693_v61 = vpop.f32.mrf.mxu1 }
 0x348   : > { %v4271_v54 = vpop.f32.mrf.mxu0  ;;  %v1697_v63 = vpop.f32.mrf.mxu1 }
 0x34a   : > { %v1538_v62 = vpop.f32.mrf.mxu0  ;;  %v1699_v5 = vpop.f32.mrf.mxu1 }
 0x34c   : > { %v4273_v0 = vpop.f32.mrf.mxu0  ;;  %v1703_v9 = vpop.f32.mrf.mxu1 }
 0x34e   : > { %v4275_v1 = vpop.f32.mrf.mxu0  ;;  %v4287_v14 = vpop.f32.mrf.mxu1 }
 0x350   : > { %v4277_v3 = vpop.f32.mrf.mxu0  ;;  %v4293_v18 = vpop.f32.mrf.mxu1 }
 0x352   : > { %v4279_v7 = vpop.f32.mrf.mxu0  ;;  %v4299_v25 = vpop.f32.mrf.mxu1 }
 0x354   : > { %v4281_v8 = vpop.f32.mrf.mxu0  ;;  %v4305_v35 = vpop.f32.mrf.mxu1 }
 0x356   : > { %v4283_v11 = vpop.f32.mrf.mxu0  ;;  %v4311_v43 = vpop.f32.mrf.mxu1 }
 0x358   : > { %v4285_v12 = vpop.f32.mrf.mxu0  ;;  %v4317_v45 = vpop.f32.mrf.mxu1 }
 0x35a   : > { %v4289_v15 = vpop.f32.mrf.mxu0  ;;  %v4323_v47 = vpop.f32.mrf.mxu1 }
 0x35c   : > { %v4291_v16 = vpop.f32.mrf.mxu0  ;;  %v4329_v52 = vpop.f32.mrf.mxu1 }
 0x35e   : > { %v4295_v20 = vpop.f32.mrf.mxu0  ;;  %v4335_v39 = vpop.f32.mrf.mxu1 }
 0x360   : > { %v4297_v22 = vpop.f32.mrf.mxu0  ;;  %v4341_v36 = vpop.f32.mrf.mxu1 }
 0x362   : > { %v4301_v26 = vpop.f32.mrf.mxu0  ;;  %v4347_v60 = vpop.f32.mrf.mxu1 }
 0x364   : > { %v4303_v33 = vpop.f32.mrf.mxu0  ;;  %v4351_v10 = vpop.f32.mrf.mxu1 }
 0x366   : > { %v4307_v38 = vpop.f32.mrf.mxu0 }
 0x368   : > { %v4309_v41 = vpop.f32.mrf.mxu0 }
 0x369   : > { %4782 = vst [vmem:[#allocation14_spill] sm:$0xff] %v4309_v41  ;;  %v4356_v41 = vpop.f32.mrf.mxu1 }
 0x36a   : > { %v4313_v44 = vpop.f32.mrf.mxu0 }
 0x36c   : > { %v4315_v19 = vpop.f32.mrf.mxu0 }
 0x36d   : > { %4783 = vst [vmem:[#allocation15_spill] sm:$0xff] %v4315_v19  ;;  %v1931_v19 = vmul.f32 %v1693_v61, %v1532_v56  ;;  %v1933_v56 = vmul.f32 %v1699_v5, %v1538_v62  ;;  %v2425_v62 = vld [vmem:[%s4757_s13 + $0xc0] sm:$0xff] }
 0x36e   : > { %v4319_v46 = vpop.f32.mrf.mxu0 }
 0x370   : > { %v4321_v32 = vpop.f32.mrf.mxu0 }
 0x371   : > { %4784 = vst [vmem:[#allocation16_spill] sm:$0xff] %v4321_v32 }
 0x372   : > { %v4325_v48 = vpop.f32.mrf.mxu0 }
 0x374   : > { %v4327_v50 = vpop.f32.mrf.mxu0 }
 0x375   : > { %4785 = vst [vmem:[#allocation17_spill] sm:$0xff] %v4327_v50 }
 0x376   : > { %v4331_v57 = vpop.f32.mrf.mxu0 }
 0x378   : > { %v4333_v59 = vpop.f32.mrf.mxu0 }
 0x379   : > { %4786 = vst [vmem:[#allocation18_spill] sm:$0xff] %v4333_v59 }
 0x37a   : > { %v4337_v24 = vpop.f32.mrf.mxu0 }
 0x37c   : > { %v4339_v37 = vpop.f32.mrf.mxu0 }
 0x37d   : > { %4787 = vst [vmem:[#allocation19_spill] sm:$0xff] %v4339_v37  ;;  %v2431_v37 = vld [vmem:[%s4757_s13 + $0xf0] sm:$0xff] }
 0x37e   : > { %v4343_v17 = vpop.f32.mrf.mxu0 }
 0x380   : > { %v4345_v34 = vpop.f32.mrf.mxu0 }
 0x381   : > { %4788 = vst [vmem:[#allocation20_spill] sm:$0xff] %v4345_v34  ;;  %v2430_v34 = vld [vmem:[%s4757_s13 + $0xe8] sm:$0xff] }
 0x382   : > { %v4349_v50 = vpop.f32.mrf.mxu0 }
 0x384   : > { %v3386_v32 = vpop.f32.mrf.mxu0 }
 0x385   : > { %v1934_v2 = vmul.f32 %v3386_v32, %v1697_v63  ;;  %v4370_v63 = vpop.f32.mrf.mxu1 }
 0x386   : > { %v1852_v59 = vpop.f32.mrf.mxu0 }
 0x387   : > { %v1932_v28 = vmul.f32 %v1852_v59, %v1691_v55  ;;  %v2429_v59 = vld [vmem:[%s4757_s13 + $0xe0] sm:$0xff]  ;;  %v2428_v55 = vld [vmem:[%s4757_s13 + $0xd8] sm:$0xff]  ;;  %v4388_v32 = vpop.f32.mrf.mxu1 }
 0x388   : > { %v3389_v27 = vpop.f32.mrf.mxu0 }
 0x389   : > { %2059 = vmatprep.mubr.f32.mxu1 %v1932_v28  ;;  %v2427_v28 = vld [vmem:[%s4757_s13 + $0xd0] sm:$0xff] }
 0x38a   : > { %v1862_v23 = vpop.f32.mrf.mxu0  ;;  %2060 = vmatmul.mubr.f32.vlgmr.msra.gmra.mxu1 %v1931_v19 }
 0x38b   : > { %2434 = vmatpush1.msra.mxu1 %v2431_v37  ;;  %2064 = vmatprep.mubr.f32.mxu1 %v1934_v2  ;;  %v1936_v19 = vmul.f32 %v1862_v23, %v1703_v9  ;;  %v2426_v37 = vld [vmem:[%s4757_s13 + $0xc8] sm:$0xff]  ;;  %v1935_v23 = vmul.f32 %v4287_v14, %v4275_v1  ;;  %v2423_v9 = vld [vmem:[%s4757_s13 + $0xb0] sm:$0xff]  ;;  %v2421_v1 = vld [vmem:[%s4757_s13 + $0xa0] sm:$0xff] }
 0x38c   : > { %v3392_v61 = vpop.f32.mrf.mxu0  ;;  %2435 = vmatprep.subr.mxu1 %v2430_v34  ;;  %v2424_v34 = vld [vmem:[%s4757_s13 + $0xb8] sm:$0xff] }
 0x38d   : > { %2436 = vmatpush1.msra.mxu1 %v2429_v59  ;;  %v1938_v59 = vmul.f32 %v3389_v27, %v4293_v18  ;;  %v2420_v14 = vld [vmem:[%s4757_s13 + $0x98] sm:$0xff]  ;;  %v1937_v27 = vmul.f32 %v4299_v25, %v4279_v7  ;;  %v2417_v7 = vld [vmem:[%s4757_s13 + $0x80] sm:$0xff] }
 0x38e   : > { %v1872_v2 = vpop.f32.mrf.mxu0  ;;  %2065 = vmatmul.mubr.f32.gmra.mxu1 %v1933_v56  ;;  %2437 = vmatprep.subr.mxu1 %v2428_v55  ;;  %v2422_v55 = vld [vmem:[%s4757_s13 + $0xa8] sm:$0xff]  ;;  %v2416_v25 = vld [vmem:[%s4757_s13 + $0x78] sm:$0xff] }
 0x38f   : > { %2069 = vmatprep.mubr.f32.mxu1 %v1936_v19  ;;  %2438 = vmatpush1.msra.mxu1 %v2427_v28  ;;  %v2419_v28 = vld [vmem:[%s4757_s13 + $0x90] sm:$0xff]  ;;  %v4407_v19 = vpop.f32.mrf.mxu1 }
 0x390   : > { %v4383_v5 = vpop.f32.mrf.mxu0  ;;  %2439 = vmatprep.subr.mxu1 %v2426_v37  ;;  %v1940_v37 = vmul.f32 %v1872_v2, %v4305_v35  ;;  %v1939_v35 = vmul.f32 %v4311_v43, %v4283_v11  ;;  %v2413_v11 = vld [vmem:[%s4757_s13 + $0x60] sm:$0xff]  ;;  %v2412_v43 = vld [vmem:[%s4757_s13 + $0x58] sm:$0xff] }
 0x391   : > { %2440 = vmatpush1.msra.mxu1 %v2425_v62  ;;  %v2418_v62 = vld [vmem:[%s4757_s13 + $0x88] sm:$0xff] }
 0x392   : > { %v1882_v56 = vpop.f32.mrf.mxu0  ;;  %2070 = vmatmul.mubr.f32.gmra.mxu1 %v1935_v23  ;;  %2441 = vmatprep.subr.mxu1 %v2424_v34  ;;  %v2415_v23 = vld [vmem:[%s4757_s13 + $0x70] sm:$0xff] }
 0x393   : > { %2074 = vmatprep.mubr.f32.mxu1 %v1938_v59  ;;  %2442 = vmatpush1.msra.mxu1 %v2423_v9  ;;  %v4426_v9 = vpop.f32.mrf.mxu1  ;;  %v1942_v59 = vmul.f32 %v3392_v61, %v4317_v45  ;;  %v1941_v45 = vmul.f32 %v4323_v47, %v4289_v15  ;;  %v2409_v15 = vld [vmem:[%s4757_s13 + $0x40] sm:$0xff]  ;;  %v2408_v47 = vld [vmem:[%s4757_s13 + $0x38] sm:$0xff] }
 0x394   : > { %v4402_v18 = vpop.f32.mrf.mxu0  ;;  %2443 = vmatprep.subr.mxu1 %v2422_v55  ;;  %v2414_v55 = vld [vmem:[%s4757_s13 + $0x68] sm:$0xff] }
 0x395   : > { %2444 = vmatpush1.msra.mxu1 %v2421_v1 }
 0x396   : > { %v1892_v34 = vpop.f32.mrf.mxu0  ;;  %2075 = vmatmul.mubr.f32.gmra.mxu1 %v1937_v27  ;;  %2445 = vmatprep.subr.mxu1 %v2420_v14  ;;  %v2411_v14 = vld [vmem:[%s4757_s13 + $0x50] sm:$0xff]  ;;  %v1757_v27 = vpop.f32.mrf.mxu1 }
 0x397   : > { %2079 = vmatprep.mubr.f32.mxu1 %v1940_v37  ;;  %2446 = vmatpush1.msra.mxu1 %v2419_v28  ;;  %v1944_v28 = vmul.f32 %v1882_v56, %v4329_v52  ;;  %v2410_v37 = vld [vmem:[%s4757_s13 + $0x48] sm:$0xff]  ;;  %v1943_v52 = vmul.f32 %v4335_v39, %v4295_v20  ;;  %v2405_v39 = vld [vmem:[%s4757_s13 + $0x20] sm:$0xff]  ;;  %v2404_v20 = vld [vmem:[%s4757_s13 + $0x18] sm:$0xff] }
 0x398   : > { %v4421_v2 = vpop.f32.mrf.mxu0  ;;  %2447 = vmatprep.subr.mxu1 %v2418_v62 }
 0x399   : > { %2448 = vmatpush1.msra.mxu1 %v2417_v7  ;;  %v2407_v7 = vld [vmem:[%s4757_s13 + $0x30] sm:$0xff] }
 0x39a   : > { %v4432_v1 = vpop.f32.mrf.mxu0  ;;  %2080 = vmatmul.mubr.f32.gmra.mxu1 %v1939_v35  ;;  %2449 = vmatprep.subr.mxu1 %v2416_v25  ;;  %v1759_v25 = vpop.f32.mrf.mxu1  ;;  %v1946_v35 = vmul.f32 %v4383_v5, %v4341_v36  ;;  %v1945_v36 = vmul.f32 %v4347_v60, %v4301_v26  ;;  %v2401_v60 = vld [vmem:[%s4757_s13] sm:$0xff]  ;;  %v1947_v26 = vmul.f32 %v4356_v41, %v4307_v38 }
 0x39b   : > { %2084 = vmatprep.mubr.f32.mxu1 %v1942_v59  ;;  %2450 = vmatpush1.msra.mxu1 %v2415_v23  ;;  %v2406_v23 = vld [vmem:[%s4757_s13 + $0x28] sm:$0xff]  ;;  %v1952_v38 = vmul.f32 %v4432_v1, %v4407_v19  ;;  %v2166_v19 = vlaneseq }
 0x39c   : > { %v4442_v61 = vpop.f32.mrf.mxu0  ;;  %2451 = vmatprep.subr.mxu1 %v2414_v55  ;;  %v2403_v55 = vld [vmem:[%s4757_s13 + $0x10] sm:$0xff] }
 0x39d   : > { %2452 = vmatpush1.msra.mxu1 %v2413_v11  ;;  %v1763_v11 = vpop.f32.mrf.mxu1 }
 0x39e   : > { %v1912_v62 = vpop.f32.mrf.mxu0  ;;  %2085 = vmatmul.mubr.f32.gmra.mxu1 %v1941_v45  ;;  %2453 = vmatprep.subr.mxu1 %v2412_v43  ;;  %v1948_v43 = vmul.f32 %v1892_v34, %v4351_v10  ;;  %v2402_v45 = vld [vmem:[%s4757_s13 + $0x8] sm:$0xff]  ;;  %v1950_v34 = vmul.f32 %v4402_v18, %v4370_v63 }
 0x39f   : > { %2089 = vmatprep.mubr.f32.mxu1 %v1944_v28  ;;  %2454 = vmatpush1.msra.mxu1 %v2411_v14  ;;  %v1765_v10 = vpop.f32.mrf.mxu1 }
 0x3a0   : > { %v4459_v56 = vpop.f32.mrf.mxu0  ;;  %2455 = vmatprep.subr.mxu1 %v2410_v37 }
 0x3a1   : > { %2456 = vmatpush1.msra.mxu1 %v2409_v15  ;;  %v1949_v15 = vmul.f32 %v4388_v32, %v4313_v44  ;;  %v1953_v44 = vmul.f32 %v1759_v25, %v4325_v48 }
 0x3a2   : > { %v4469_v59 = vpop.f32.mrf.mxu0  ;;  %2090 = vmatmul.mubr.f32.gmra.mxu1 %v1943_v52  ;;  %2457 = vmatprep.subr.mxu1 %v2408_v47  ;;  %v1769_v52 = vpop.f32.mrf.mxu1 }
 0x3a3   : > { %2094 = vmatprep.mubr.f32.mxu1 %v1946_v35  ;;  %2458 = vmatpush1.msra.mxu1 %v2407_v7  ;;  %v1951_v7 = vmul.f32 %v4426_v9, %v4319_v46  ;;  %v1954_v35 = vmul.f32 %v4421_v2, %v1757_v27 }
 0x3a4   : > { %v4479_v5 = vpop.f32.mrf.mxu0  ;;  %2459 = vmatprep.subr.mxu1 %v2406_v23  ;;  %v1771_v18 = vpop.f32.mrf.mxu1 }
 0x3a5   : > { %2460 = vmatpush1.msra.mxu1 %v2405_v39  ;;  %v1957_v27 = vmul.f32 %v1771_v18, %v4337_v24 }
 0x3a6   : > { %2095 = vmatmul.mubr.f32.gmra.mxu1 %v1945_v36  ;;  %v4488_v14 = vpop.f32.mrf.mxu0  ;;  %2461 = vmatprep.subr.mxu1 %v2404_v20  ;;  %v1775_v39 = vpop.f32.mrf.mxu1  ;;  %v1956_v20 = vmul.f32 %v1912_v62, %v1763_v11  ;;  %v1955_v36 = vmul.f32 %v1765_v10, %v4331_v57  ;;  %v2164_v57 = vld [vmem:[%s4756_s12] sm:$0x3] }
 0x3a7   : > { %2099 = vmatprep.mubr.f32.mxu1 %v1948_v43  ;;  %2462 = vmatpush1.msra.mxu1 %v2403_v55  ;;  %v1958_v55 = vmul.f32 %v4442_v61, %v1769_v52  ;;  %v2167_v43 = vshrl.u32 %v2166_v19, 7  ;;  %v1960_v62 = vmul.f32 %v4469_v59, %v1775_v39 }
 0x3a8   : > { %v4495_v28 = vpop.f32.mrf.mxu0  ;;  %2463 = vmatprep.subr.mxu1 %v2402_v45  ;;  %v1777_v9 = vpop.f32.mrf.mxu1 }
 0x3a9   : > { %2464 = vmatpush1.msra.mxu1 %v2401_v60  ;;  %v2172_v48 = vsub.s32 1, %v2167_v43  ;;  %v2168_v11 = vsub.s32 0, %v2167_v43  ;;  %v1959_v61 = vmul.f32 %v1777_v9, %v4343_v17 }
 0x3aa   : > { %2100 = vmatmul.mubr.f32.gmra.mxu1 %v1947_v26  ;;  %v2298_v37 = vpop.f32.mrf.mxu0  ;;  %v1781_v45 = vpop.f32.mrf.mxu1 }
 0x3ab   : > { %2104 = vmatprep.mubr.f32.mxu1 %v1950_v34  ;;  %v4519_v26 = vrot.slane %v2164_v57, %v2172_v48  ;;  %v1962_v24 = vmul.f32 %v4459_v56, %v1781_v45 }
 0x3ac   : > { %v4501_v47 = vpop.f32.mrf.mxu0  ;;  %v1783_v34 = vpop.f32.mrf.mxu1 }
 0x3ad   : > { %v1961_v52 = vmul.f32 %v1783_v34, %v4349_v50  ;;  %v2299_v56 = vadd.f32 %v2298_v37, %v4519_v26 }
 0x3ae   : > { %2105 = vmatmul.mubr.f32.gmra.mxu1 %v1949_v15  ;;  %v2304_v41 = vpop.f32.mrf.mxu0  ;;  %v4522_v15 = vrot.slane %v2164_v57, %v2168_v11 }
 0x3af   : > { %2109 = vmatprep.mubr.f32.mxu1 %v1952_v38  ;;  %v2293_v38 = vadd.f32 %v4488_v14, %v4519_v26  ;;  %v2305_v14 = vadd.f32 %v2304_v41, %v4519_v26 }
 0x3b0   : > { %v4507_v63 = vpop.f32.mrf.mxu0  ;;  %v2291_v17 = vadd.f32 %v4479_v5, %v4522_v15  ;;  %v2303_v5 = vadd.f32 %v4501_v47, %v4522_v15 }
 0x3b2   : > { %2110 = vmatmul.mubr.f32.gmra.mxu1 %v1951_v7  ;;  %v2310_v23 = vpop.f32.mrf.mxu0 }
 0x3b3   : > { %2114 = vmatprep.mubr.f32.mxu1 %v1954_v35  ;;  %v4789_v35 = vmov 0.0   ;;  %v2311_v37 = vadd.f32 %v2310_v23, %v4519_v26 }
 0x3b4   : > { %v2314_v32 = vpop.f32.mrf.mxu0 }
 0x3b6   : > { %2115 = vmatmul.mubr.f32.gmra.mxu1 %v1953_v44  ;;  %v2316_v1 = vpop.f32.mrf.mxu0  ;;  %v2385_v44 = vmul.f32 %v2293_v38, %v2291_v17 }
 0x3b7   : > { %2119 = vmatprep.mubr.f32.mxu1 %v1956_v20  ;;  %v2297_v20 = vadd.f32 %v4495_v28, %v4522_v15  ;;  %v2309_v28 = vadd.f32 %v4507_v63, %v4522_v15  ;;  %v2317_v41 = vadd.f32 %v2316_v1, %v4519_v26 }
 0x3b8   : > { %v2320_v46 = vpop.f32.mrf.mxu0 }
 0x3b9   : > { %v2386_v50 = vmul.f32 %v2299_v56, %v2297_v20  ;;  %v2321_v45 = vadd.f32 %v2320_v46, %v4522_v15 }
 0x3ba   : > { %2120 = vmatmul.mubr.f32.gmra.mxu1 %v1955_v36  ;;  %v2322_v2 = vpop.f32.mrf.mxu0  ;;  %v2387_v36 = vmul.f32 %v2305_v14, %v2303_v5 }
 0x3bb   : > { %2124 = vmatprep.mubr.f32.mxu1 %v1958_v55  ;;  %v2388_v55 = vmul.f32 %v2311_v37, %v2309_v28  ;;  %v2323_v48 = vadd.f32 %v2322_v2, %v4519_v26 }
 0x3bc   : > { %v2326_v25 = vpop.f32.mrf.mxu0 }
 0x3bd   : > { %v2390_v63 = vmul.f32 %v2323_v48, %v2321_v45  ;;  %v2327_v1 = vadd.f32 %v2326_v25, %v4522_v15  ;;  %v2628_v48 = vld [vmem:[%s4758_s14 + $0x10] sm:$0xff] }
 0x3be   : > { %2125 = vmatmul.mubr.f32.gmra.mxu1 %v1957_v27  ;;  %v2328_v60 = vpop.f32.mrf.mxu0  ;;  %v2315_v27 = vadd.f32 %v2314_v32, %v4522_v15 }
 0x3bf   : > { %2129 = vmatprep.mubr.f32.mxu1 %v1960_v62  ;;  %v2329_v62 = vadd.f32 %v2328_v60, %v4519_v26 }
 0x3c0   : > { %v2332_v10 = vpop.f32.mrf.mxu0  ;;  %v2389_v47 = vmul.f32 %v2317_v41, %v2315_v27 }
 0x3c1   : > { %v2391_v32 = vmul.f32 %v2329_v62, %v2327_v1  ;;  %v2333_v2 = vadd.f32 %v2332_v10, %v4522_v15  ;;  %v2626_v1 = vld [vmem:[%s4758_s14] sm:$0xff] }
 0x3c2   : > { %2130 = vmatmul.mubr.f32.gmra.mxu1 %v1959_v61  ;;  %v2334_v59 = vpop.f32.mrf.mxu0 }
 0x3c3   : > { %2134 = vmatprep.mubr.f32.mxu1 %v1962_v24  ;;  %v2335_v57 = vadd.f32 %v2334_v59, %v4519_v26 }
 0x3c4   : > { %v2338_v7 = vpop.f32.mrf.mxu0 }
 0x3c5   : > { %v2392_v46 = vmul.f32 %v2335_v57, %v2333_v2  ;;  %v2339_v60 = vadd.f32 %v2338_v7, %v4522_v15  ;;  %v2629_v7 = vld [vmem:[%s4758_s14 + $0x18] sm:$0xff] }
 0x3c6   : > { %2135 = vmatmul.mubr.f32.gmra.mxu1 %v1961_v52  ;;  %v2340_v18 = vpop.f32.mrf.mxu0  ;;  %3408 = vmatprep.subr.mxu0 %v2629_v7 }
 0x3c7   : > { %2497 = vmatprep.mubr.f32.mxu1 %v4789_v35  ;;  %v2341_v34 = vadd.f32 %v2340_v18, %v4519_v26  ;;  %3409 = vmatpush3.msra.mxu0 %v2629_v7 }
 0x3c8   : > { %v2344_v39 = vpop.f32.mrf.mxu0  ;;  %3410 = vmatprep.subr.mxu0 %v2628_v48 }
 0x3c9   : > { %v2393_v25 = vmul.f32 %v2341_v34, %v2339_v60  ;;  %v2345_v59 = vadd.f32 %v2344_v39, %v4522_v15  ;;  %3411 = vmatpush3.msra.mxu0 %v2628_v48 }
 0x3ca   : > { %2498 = vmatmul.mubr.f32.vlgmr.msra.gmra.mxu1 %v2385_v44  ;;  %v2346_v19 = vpop.f32.mrf.mxu0 }
 0x3cb   : > { %2503 = vmatprep.mubr.f32.mxu1 %v4789_v35  ;;  %v2347_v52 = vadd.f32 %v2346_v19, %v4519_v26 }
 0x3cc   : > { %v2350_v9 = vpop.f32.mrf.mxu0 }
 0x3cd   : > { %v2394_v10 = vmul.f32 %v2347_v52, %v2345_v59  ;;  %v2351_v18 = vadd.f32 %v2350_v9, %v4522_v15 }
 0x3ce   : > { %2504 = vmatmul.mubr.f32.gmra.mxu1 %v2386_v50  ;;  %v2352_v43 = vpop.f32.mrf.mxu0 }
 0x3cf   : > { %2509 = vmatprep.mubr.f32.mxu1 %v4789_v35  ;;  %v2353_v17 = vadd.f32 %v2352_v43, %v4519_v26 }
 0x3d0   : > { %v2356_v23 = vpop.f32.mrf.mxu0 }
 0x3d1   : > { %v2395_v56 = vmul.f32 %v2353_v17, %v2351_v18  ;;  %v2357_v50 = vadd.f32 %v2356_v23, %v4522_v15 }
 0x3d2   : > { %2510 = vmatmul.mubr.f32.gmra.mxu1 %v2387_v36  ;;  %v2358_v11 = vpop.f32.mrf.mxu0 }
 0x3d3   : > { %2515 = vmatprep.mubr.f32.mxu1 %v4789_v35  ;;  %v2359_v39 = vadd.f32 %v2358_v11, %v4519_v26  ;;  %v2627_v11 = vld [vmem:[%s4758_s14 + $0x8] sm:$0xff] }
 0x3d4   : > { %v2362_v61 = vpop.f32.mrf.mxu0  ;;  %3412 = vmatprep.subr.mxu0 %v2627_v11 }
 0x3d5   : > { %v2396_v14 = vmul.f32 %v2359_v39, %v2357_v50  ;;  %v2363_v36 = vadd.f32 %v2362_v61, %v4522_v15  ;;  %3413 = vmatpush3.msra.mxu0 %v2627_v11 }
 0x3d6   : > { %2516 = vmatmul.mubr.f32.gmra.mxu1 %v2388_v55  ;;  %v2364_v24 = vpop.f32.mrf.mxu0  ;;  %3414 = vmatprep.subr.mxu0 %v2626_v1 }
 0x3d7   : > { %2521 = vmatprep.mubr.f32.mxu1 %v4789_v35  ;;  %v2365_v19 = vadd.f32 %v2364_v24, %v4519_v26  ;;  %3415 = vmatpush3.msra.mxu0 %v2626_v1 }
 0x3d8   : > { %v2368_v38 = vpop.f32.mrf.mxu0 }
 0x3d9   : > { %v2397_v37 = vmul.f32 %v2365_v19, %v2363_v36  ;;  %v2369_v55 = vadd.f32 %v2368_v38, %v4522_v15 }
 0x3da   : > { %2522 = vmatmul.mubr.f32.gmra.mxu1 %v2389_v47  ;;  %v2370_v44 = vpop.f32.mrf.mxu0 }
 0x3db   : > { %2527 = vmatprep.mubr.f32.mxu1 %v4789_v35  ;;  %v2371_v9 = vadd.f32 %v2370_v44, %v4519_v26 }
 0x3dc   : > { %v2374_v20 = vpop.f32.mrf.mxu0 }
 0x3dd   : > { %v2398_v41 = vmul.f32 %v2371_v9, %v2369_v55  ;;  %v2375_v47 = vadd.f32 %v2374_v20, %v4522_v15 }
 0x3de   : > { %2528 = vmatmul.mubr.f32.gmra.mxu1 %v2390_v63  ;;  %v2376_v5 = vpop.f32.mrf.mxu0 }
 0x3df   : > { %2533 = vmatprep.mubr.f32.mxu1 %v4789_v35  ;;  %v2377_v43 = vadd.f32 %v2376_v5, %v4519_v26 }
 0x3e0   : > { %v2380_v28 = vpop.f32.mrf.mxu0 }
 0x3e1   : > { %v2399_v23 = vmul.f32 %v2377_v43, %v2375_v47  ;;  %v2381_v63 = vadd.f32 %v2380_v28, %v4522_v15 }
 0x3e2   : > { %2534 = vmatmul.mubr.f32.gmra.mxu1 %v2391_v32  ;;  %v2382_v27 = vpop.f32.mrf.mxu0 }
 0x3e3   : > { %2539 = vmatprep.mubr.f32.mxu1 %v4789_v35  ;;  %v2383_v45 = vadd.f32 %v2382_v27, %v4519_v26 }
 0x3e5   : > { %v2400_v62 = vmul.f32 %v2383_v45, %v2381_v63 }
 0x3e6   : > { %2540 = vmatmul.mubr.f32.gmra.mxu1 %v2392_v46 }
 0x3e7   : > { %2545 = vmatprep.mubr.f32.mxu1 %v4789_v35 }
 0x3ea   : > { %2546 = vmatmul.mubr.f32.gmra.mxu1 %v2393_v25 }
 0x3eb   : > { %2551 = vmatprep.mubr.f32.mxu1 %v4789_v35 }
 0x3ee   : > { %2552 = vmatmul.mubr.f32.gmra.mxu1 %v2394_v10 }
 0x3ef   : > { %2557 = vmatprep.mubr.f32.mxu1 %v4789_v35 }
 0x3f2   : > { %2558 = vmatmul.mubr.f32.gmra.mxu1 %v2395_v56 }
 0x3f3   : > { %2563 = vmatprep.mubr.f32.mxu1 %v4789_v35 }
 0x3f6   : > { %2564 = vmatmul.mubr.f32.gmra.mxu1 %v2396_v14 }
 0x3f7   : > { %2569 = vmatprep.mubr.f32.mxu1 %v4789_v35 }
 0x3fa   : > { %2570 = vmatmul.mubr.f32.gmra.mxu1 %v2397_v37 }
 0x3fb   : > { %2575 = vmatprep.mubr.f32.mxu1 %v4789_v35 }
 0x3fe   : > { %2576 = vmatmul.mubr.f32.gmra.mxu1 %v2398_v41 }
 0x3ff   : > { %2581 = vmatprep.mubr.f32.mxu1 %v4789_v35 }
 0x402   : > { %2582 = vmatmul.mubr.f32.gmra.mxu1 %v2399_v23 }
 0x403   : > { %2587 = vmatprep.mubr.f32.mxu1 %v4789_v35 }
 0x406   : > { %2588 = vmatmul.mubr.f32.gmra.mxu1 %v2400_v62 }
 0x44a   : > { %v3196_v26 = vpop.f32.mrf.mxu1 }
 0x44c   : > { %v3197_v32 = vpop.f32.mrf.mxu1 }
 0x44d   : > { %v3198_v15 = vadd.f32 %v3197_v32, %v3196_v26 }
 0x44e   : > { %v3199_v57 = vpop.f32.mrf.mxu1 }
 0x450   : > { %v3200_v61 = vpop.f32.mrf.mxu1 }
 0x451   : > { %v3201_v35 = vadd.f32 %v3200_v61, %v3199_v57 }
 0x452   : > { %v3202_v2 = vpop.f32.mrf.mxu1 }
 0x454   : > { %v3203_v46 = vpop.f32.mrf.mxu1 }
 0x455   : > { %v3204_v34 = vadd.f32 %v3203_v46, %v3202_v2  ;;  %v2140_v46 = vadd.f32 %v3198_v15, %v4269_v42 }
 0x456   : > { %v3205_v24 = vpop.f32.mrf.mxu1 }
 0x457   : > { %v2142_v42 = vadd.f32 %v3204_v34, %v4273_v0 }
 0x458   : > { %v3206_v60 = vpop.f32.mrf.mxu1 }
 0x459   : > { %v3207_v25 = vadd.f32 %v3206_v60, %v3205_v24 }
 0x45a   : > { %v3208_v52 = vpop.f32.mrf.mxu1 }
 0x45c   : > { %v3209_v38 = vpop.f32.mrf.mxu1 }
 0x45d   : > { %v3210_v59 = vadd.f32 %v3209_v38, %v3208_v52 }
 0x45e   : > { %v3211_v10 = vpop.f32.mrf.mxu1 }
 0x460   : > { %v3212_v17 = vpop.f32.mrf.mxu1 }
 0x461   : > { %v4590_v44 = vadd.f32 %v3212_v17, %v3211_v10  ;;  %v2141_v10 = vadd.f32 %v3201_v35, %v4271_v54  ;;  %v1365_v17 = vmul.f32 -2.0, %v3851_v13  ;;  %v2143_v13 = vadd.f32 %v3207_v25, %v4277_v3 }
 0x462   : > { %v3214_v18 = vpop.f32.mrf.mxu1  ;;  %v1367_v35 = vmul.f32 -2.0, %v3875_v30 }
 0x463   : > { %v2145_v25 = vadd.f32 %v4590_v44, %v4285_v12 }
 0x464   : > { %v3215_v7 = vpop.f32.mrf.mxu1 }
 0x465   : > { %v4592_v56 = vadd.f32 %v3215_v7, %v3214_v18 }
 0x466   : > { %v3217_v39 = vpop.f32.mrf.mxu1 }
 0x468   : > { %v3218_v20 = vpop.f32.mrf.mxu1 }
 0x469   : > { %v4594_v50 = vadd.f32 %v3218_v20, %v3217_v39  ;;  %v1381_v39 = vmul.f32 %v1365_v17, %v3878_v31  ;;  %v1383_v31 = vmul.f32 %v1367_v35, %v3918_v53  ;;  %v4793_v17 = vld [vmem:[#allocation7_spill] sm:$0xff]  ;;  %v4797_v35 = vld [vmem:[#allocation16_spill] sm:$0xff] }
 0x46a   : > { %v3220_v14 = vpop.f32.mrf.mxu1 }
 0x46c   : > { %v3221_v19 = vpop.f32.mrf.mxu1 }
 0x46d   : > { %v4596_v5 = vadd.f32 %v3221_v19, %v3220_v14 }
 0x46e   : > { %v3223_v36 = vpop.f32.mrf.mxu1 }
 0x470   : > { %v3224_v37 = vpop.f32.mrf.mxu1 }
 0x471   : > { %v4598_v9 = vadd.f32 %v3224_v37, %v3223_v36 }
 0x472   : > { %v3226_v28 = vpop.f32.mrf.mxu1 }
 0x474   : > { %v3227_v55 = vpop.f32.mrf.mxu1 }
 0x475   : > { %v4600_v41 = vadd.f32 %v3227_v55, %v3226_v28  ;;  %v2144_v28 = vadd.f32 %v3210_v59, %v4281_v8 }
 0x476   : > { %v3229_v43 = vpop.f32.mrf.mxu1 }
 0x478   : > { %v3230_v27 = vpop.f32.mrf.mxu1 }
 0x479   : > { %v4602_v47 = vadd.f32 %v3230_v27, %v3229_v43 }
 0x47a   : > { %v3232_v48 = vpop.f32.mrf.mxu1 }
 0x47c   : > { %v3233_v23 = vpop.f32.mrf.mxu1 }
 0x47d   : > { %v4604_v45 = vadd.f32 %v3233_v23, %v3232_v48  ;;  %v2146_v23 = vadd.f32 %v4592_v56, %v4291_v16 }
 0x47e   : > { %v3235_v63 = vpop.f32.mrf.mxu1 }
 0x480   : > { %v3236_v62 = vpop.f32.mrf.mxu1 }
 0x481   : > { %v4606_v11 = vadd.f32 %v3236_v62, %v3235_v63  ;;  %v2147_v62 = vadd.f32 %v4594_v50, %v4297_v22  ;;  %v4791_v50 = vld [vmem:[#allocation2_spill] sm:$0xff] }
 0x482   : > { %v3238_v1 = vpop.f32.mrf.mxu1 }
 0x484   : > { %v3239_v26 = vpop.f32.mrf.mxu1 }
 0x485   : > { %v4608_v32 = vadd.f32 %v3239_v26, %v3238_v1 }
 0x486   : > { %v3241_v57 = vpop.f32.mrf.mxu1 }
 0x488   : > { %v3242_v61 = vpop.f32.mrf.mxu1 }
 0x489   : > { %v4610_v2 = vadd.f32 %v3242_v61, %v3241_v57  ;;  %v2148_v57 = vadd.f32 %v4596_v5, %v4303_v33 }
 0x48a   : > { %v2499_v24 = vpop.f32.mrf.mxu1 }
 0x48b   : > { %v4613_v60 = vadd.f32 %v2499_v24, %v2140_v46 }
 0x48c   : > { %v2501_v52 = vpop.f32.mrf.mxu1 }
 0x48d   : > { %v2610_v38 = vmul.f32 %v2501_v52, %v3873_v29  ;;  %v4792_v52 = vld [vmem:[#allocation14_spill] sm:$0xff] }
 0x48e   : > { %v2505_v18 = vpop.f32.mrf.mxu1 }
 0x48f   : > { %v4618_v7 = vadd.f32 %v2505_v18, %v2141_v10  ;;  %3416 = vmatprep.mubr.msk.f32.mxu0 %vm744_vm2, %v2610_v38  ;;  %v2149_v38 = vadd.f32 %v4598_v9, %v4792_v52 }
 0x490   : > { %v2507_v20 = vpop.f32.mrf.mxu1 }
 0x491   : > { %v2611_v14 = vmul.f32 %v2507_v20, %v1381_v39  ;;  %v4794_v39 = vld [vmem:[#allocation15_spill] sm:$0xff] }
 0x492   : > { %v2511_v15 = vpop.f32.mrf.mxu1  ;;  %v2150_v20 = vadd.f32 %v4600_v41, %v4794_v39 }
 0x493   : > { %v4623_v19 = vadd.f32 %v2511_v15, %v2142_v42  ;;  %3417 = vmatmul.mubr.msk.f32.vlgmr.msra.gmra.mxu0 %vm744_vm2, %v2611_v14  ;;  %v4795_v15 = vld [vmem:[#allocation8_spill] sm:$0xff] }
 0x494   : > { %v2513_v29 = vpop.f32.mrf.mxu1 }
 0x495   : > { %v2612_v54 = vmul.f32 %v2513_v29, %v3895_v40  ;;  %v1369_v40 = vmul.f32 -2.0, %v3914_v51  ;;  %v1375_v29 = vmul.f32 -2.0, %v4795_v15 }
 0x496   : > { %v2517_v36 = vpop.f32.mrf.mxu1 }
 0x497   : > { %v4629_v37 = vadd.f32 %v2517_v36, %v2143_v13  ;;  %3419 = vmatprep.mubr.msk.f32.mxu0 %vm744_vm2, %v2612_v54  ;;  %v1385_v53 = vmul.f32 %v1369_v40, %v3951_v6  ;;  %v4796_v54 = vld [vmem:[#allocation3_spill] sm:$0xff]  ;;  %v2151_v36 = vadd.f32 %v4602_v47, %v4797_v35  ;;  %v4799_v40 = vld [vmem:[#allocation17_spill] sm:$0xff] }
 0x498   : > { %v2519_v0 = vpop.f32.mrf.mxu1 }
 0x499   : > { %v2613_v34 = vmul.f32 %v2519_v0, %v1383_v31 }
 0x49a   : > { %v2523_v55 = vpop.f32.mrf.mxu1 }
 0x49b   : > { %v4634_v43 = vadd.f32 %v2523_v55, %v2144_v28  ;;  %3420 = vmatmul.mubr.msk.f32.gmra.mxu0 %vm744_vm2, %v2613_v34  ;;  %v4798_v34 = vld [vmem:[#allocation9_spill] sm:$0xff] }
 0x49c   : > { %v2525_v3 = vpop.f32.mrf.mxu1  ;;  %v1391_v41 = vmul.f32 %v1375_v29, %v4798_v34 }
 0x49d   : > { %v2614_v30 = vmul.f32 %v2525_v3, %v3912_v49  ;;  %v1371_v49 = vmul.f32 -2.0, %v3947_v4  ;;  %v2152_v3 = vadd.f32 %v4604_v45, %v4799_v40 }
 0x49e   : > { %v2529_v27 = vpop.f32.mrf.mxu1 }
 0x49f   : > { %v4641_v48 = vadd.f32 %v2529_v27, %v2145_v25  ;;  %3422 = vmatprep.mubr.msk.f32.mxu0 %vm744_vm2, %v2614_v30  ;;  %v1387_v16 = vmul.f32 %v1371_v49, %v3979_v21  ;;  %v4800_v27 = vld [vmem:[#allocation10_spill] sm:$0xff] }
 0x4a0   : > { %v2531_v8 = vpop.f32.mrf.mxu1 }
 0x4a1   : > { %v2615_v59 = vmul.f32 %v2531_v8, %v1385_v53  ;;  %v1377_v53 = vmul.f32 -2.0, %v4800_v27  ;;  %v4801_v8 = vld [vmem:[#allocation4_spill] sm:$0xff] }
 0x4a2   : > { %v2535_v63 = vpop.f32.mrf.mxu1 }
 0x4a3   : > { %v4647_v51 = vadd.f32 %v2535_v63, %v2146_v23  ;;  %3423 = vmatmul.mubr.msk.f32.gmra.mxu0 %vm744_vm2, %v2615_v59  ;;  %v4802_v23 = vld [vmem:[#allocation18_spill] sm:$0xff] }
 0x4a4   : > { %v2537_v12 = vpop.f32.mrf.mxu1  ;;  %v2153_v63 = vadd.f32 %v4606_v11, %v4802_v23  ;;  %v4806_v11 = vld [vmem:[#allocation6_spill] sm:$0xff] }
 0x4a5   : > { %v2616_v44 = vmul.f32 %v2537_v12, %v3930_v58  ;;  %v4790_v58 = vld [vmem:[#allocation5_spill] sm:$0xff] }
 0x4a6   : > { %v2541_v1 = vpop.f32.mrf.mxu1  ;;  %v1373_v46 = vmul.f32 -2.0, %v4790_v58 }
 0x4a7   : > { %v4654_v6 = vadd.f32 %v2541_v1, %v2147_v62  ;;  %3425 = vmatprep.mubr.msk.f32.mxu0 %vm744_vm2, %v2616_v44  ;;  %v4803_v44 = vld [vmem:[#allocation11_spill] sm:$0xff] }
 0x4a8   : > { %v2543_v56 = vpop.f32.mrf.mxu1  ;;  %v1389_v33 = vmul.f32 %v1373_v46, %v4793_v17  ;;  %v1393_v62 = vmul.f32 %v1377_v53, %v4803_v44 }
 0x4a9   : > { %v2617_v26 = vmul.f32 %v2543_v56, %v1387_v16  ;;  %v4804_v16 = vld [vmem:[#allocation19_spill] sm:$0xff] }
 0x4aa   : > { %v2547_v61 = vpop.f32.mrf.mxu1  ;;  %v2154_v56 = vadd.f32 %v4608_v32, %v4804_v16 }
 0x4ab   : > { %v4660_v4 = vadd.f32 %v2547_v61, %v2148_v57  ;;  %3426 = vmatmul.mubr.msk.f32.gmra.mxu0 %vm744_vm2, %v2617_v26  ;;  %v4805_v61 = vld [vmem:[#allocation12_spill] sm:$0xff] }
 0x4ac   : > { %v2549_v22 = vpop.f32.mrf.mxu1  ;;  %v1379_v58 = vmul.f32 -2.0, %v4805_v61 }
 0x4ad   : > { %v2618_v24 = vmul.f32 %v2549_v22, %v4791_v50  ;;  %v4807_v50 = vld [vmem:[#allocation20_spill] sm:$0xff] }
 0x4ae   : > { %v2553_v10 = vpop.f32.mrf.mxu1 }
 0x4af   : > { %v4667_v21 = vadd.f32 %v2553_v10, %v2149_v38  ;;  %3428 = vmatprep.mubr.msk.f32.mxu0 %vm744_vm2, %v2618_v24  ;;  %v2155_v24 = vadd.f32 %v4610_v2, %v4807_v50  ;;  %v4808_v10 = vld [vmem:[#allocation13_spill] sm:$0xff] }
 0x4b0   : > { %v2555_v5 = vpop.f32.mrf.mxu1  ;;  %v1395_v17 = vmul.f32 %v1379_v58, %v4808_v10 }
 0x4b1   : > { %v2619_v18 = vmul.f32 %v2555_v5, %v1389_v33 }
 0x4b2   : > { %v2559_v14 = vpop.f32.mrf.mxu1 }
 0x4b3   : > { %v4673_v42 = vadd.f32 %v2559_v14, %v2150_v20  ;;  %3429 = vmatmul.mubr.msk.f32.gmra.mxu0 %vm744_vm2, %v2619_v18 }
 0x4b4   : > { %v2561_v9 = vpop.f32.mrf.mxu1 }
 0x4b5   : > { %v2620_v13 = vmul.f32 %v2561_v9, %v4796_v54 }
 0x4b6   : > { %v2565_v31 = vpop.f32.mrf.mxu1 }
 0x4b7   : > { %v4680_v0 = vadd.f32 %v2565_v31, %v2151_v36  ;;  %3431 = vmatprep.mubr.msk.f32.mxu0 %vm744_vm2, %v2620_v13 }
 0x4b8   : > { %v2567_v28 = vpop.f32.mrf.mxu1 }
 0x4b9   : > { %v2621_v55 = vmul.f32 %v2567_v28, %v1391_v41 }
 0x4ba   : > { %v2571_v30 = vpop.f32.mrf.mxu1 }
 0x4bb   : > { %v4686_v25 = vadd.f32 %v2571_v30, %v2152_v3  ;;  %3432 = vmatmul.mubr.msk.f32.gmra.mxu0 %vm744_vm2, %v2621_v55 }
 0x4bc   : > { %v2573_v47 = vpop.f32.mrf.mxu1 }
 0x4bd   : > { %v2622_v59 = vmul.f32 %v2573_v47, %v4801_v8 }
 0x4be   : > { %v2577_v49 = vpop.f32.mrf.mxu1 }
 0x4bf   : > { %v2607_v12 = vadd.f32 %v2577_v49, %v2153_v63  ;;  %3434 = vmatprep.mubr.msk.f32.mxu0 %vm744_vm2, %v2622_v59 }
 0x4c0   : > { %v2579_v45 = vpop.f32.mrf.mxu1 }
 0x4c1   : > { %v2623_v1 = vmul.f32 %v2579_v45, %v1393_v62 }
 0x4c2   : > { %v2583_v26 = vpop.f32.mrf.mxu1 }
 0x4c3   : > { %v2608_v57 = vadd.f32 %v2583_v26, %v2154_v56  ;;  %3435 = vmatmul.mubr.msk.f32.gmra.mxu0 %vm744_vm2, %v2623_v1 }
 0x4c4   : > { %v2585_v46 = vpop.f32.mrf.mxu1 }
 0x4c5   : > { %v2624_v22 = vmul.f32 %v2585_v46, %v4806_v11 }
 0x4c6   : > { %v2589_v52 = vpop.f32.mrf.mxu1 }
 0x4c7   : > { %v2609_v38 = vadd.f32 %v2589_v52, %v2155_v24  ;;  %3437 = vmatprep.mubr.msk.f32.mxu0 %vm744_vm2, %v2624_v22 }
 0x4c8   : > { %v2591_v33 = vpop.f32.mrf.mxu1 }
 0x4c9   : > { %v2625_v32 = vmul.f32 %v2591_v33, %v1395_v17 }
 0x4cb   : > { %3438 = vmatmul.mubr.msk.f32.gmra.mxu0 %vm744_vm2, %v2625_v32 }
 0x553   : > { %v3418_v2 = vpop.f32.mrf.mxu0 }
 0x554   : > { %v2824_v5 = vadd.f32 %v3418_v2, %v4618_v7 }
 0x555   : > { %v2744_v18 = vpop.f32.mrf.mxu0 }
 0x556   : > { %2840 = vst [vmem:[%s4710_s29 + $0x8] sm:$0xff] %v2824_v5  ;;  %v2823_v39 = vadd.f32 %v2744_v18, %v4613_v60 }
 0x558   : > { %2839 = vst [vmem:[%s4710_s29] sm:$0xff] %v2823_v39 }
 0x55b   : > { %v3421_v20 = vpop.f32.mrf.mxu0 }
 0x55c   : > { %v2826_v14 = vadd.f32 %v3421_v20, %v4629_v37 }
 0x55d   : > { %v2754_v15 = vpop.f32.mrf.mxu0 }
 0x55e   : > { %2842 = vst [vmem:[%s4710_s29 + $0x18] sm:$0xff] %v2826_v14  ;;  %v2825_v29 = vadd.f32 %v2754_v15, %v4623_v19 }
 0x560   : > { %2841 = vst [vmem:[%s4710_s29 + $0x10] sm:$0xff] %v2825_v29 }
 0x563   : > { %v3424_v9 = vpop.f32.mrf.mxu0 }
 0x564   : > { %v2828_v7 = vadd.f32 %v3424_v9, %v4641_v48 }
 0x565   : > { %v2764_v54 = vpop.f32.mrf.mxu0 }
 0x566   : > { %2844 = vst [vmem:[%s4710_s29 + $0x28] sm:$0xff] %v2828_v7  ;;  %v2827_v60 = vadd.f32 %v2764_v54, %v4634_v43 }
 0x568   : > { %2843 = vst [vmem:[%s4710_s29 + $0x20] sm:$0xff] %v2827_v60 }
 0x56b   : > { %v3427_v13 = vpop.f32.mrf.mxu0 }
 0x56c   : > { %v2830_v37 = vadd.f32 %v3427_v13, %v4654_v6 }
 0x56d   : > { %v2774_v35 = vpop.f32.mrf.mxu0 }
 0x56e   : > { %2846 = vst [vmem:[%s4710_s29 + $0x38] sm:$0xff] %v2830_v37  ;;  %v2829_v19 = vadd.f32 %v2774_v35, %v4647_v51 }
 0x570   : > { %2845 = vst [vmem:[%s4710_s29 + $0x30] sm:$0xff] %v2829_v19 }
 0x573   : > { %v3430_v36 = vpop.f32.mrf.mxu0 }
 0x574   : > { %v2832_v48 = vadd.f32 %v3430_v36, %v4667_v21 }
 0x575   : > { %v2784_v31 = vpop.f32.mrf.mxu0 }
 0x576   : > { %2848 = vst [vmem:[%s4710_s29 + $0x48] sm:$0xff] %v2832_v48  ;;  %v2831_v43 = vadd.f32 %v2784_v31, %v4660_v4 }
 0x578   : > { %2847 = vst [vmem:[%s4710_s29 + $0x40] sm:$0xff] %v2831_v43 }
 0x57b   : > { %v3433_v34 = vpop.f32.mrf.mxu0 }
 0x57c   : > { %v2834_v6 = vadd.f32 %v3433_v34, %v4680_v0 }
 0x57d   : > { %v2794_v41 = vpop.f32.mrf.mxu0 }
 0x57e   : > { %2850 = vst [vmem:[%s4710_s29 + $0x58] sm:$0xff] %v2834_v6  ;;  %v2833_v51 = vadd.f32 %v2794_v41, %v4673_v42 }
 0x580   : > { %2849 = vst [vmem:[%s4710_s29 + $0x50] sm:$0xff] %v2833_v51 }
 0x583   : > { %v3436_v28 = vpop.f32.mrf.mxu0 }
 0x584   : > { %v2836_v55 = vadd.f32 %v3436_v28, %v2607_v12 }
 0x585   : > { %v2804_v40 = vpop.f32.mrf.mxu0 }
 0x586   : > { %2852 = vst [vmem:[%s4710_s29 + $0x68] sm:$0xff] %v2836_v55  ;;  %v2835_v21 = vadd.f32 %v2804_v40, %v4686_v25 }
 0x588   : > { %2851 = vst [vmem:[%s4710_s29 + $0x60] sm:$0xff] %v2835_v21 }
 0x58b   : > { %v3439_v3 = vpop.f32.mrf.mxu0 }
 0x58c   : > { %v2838_v4 = vadd.f32 %v3439_v3, %v2609_v38 }
 0x58d   : > { %v2814_v30 = vpop.f32.mrf.mxu0 }
 0x58e   : > { %2854 = vst [vmem:[%s4710_s29 + $0x78] sm:$0xff] %v2838_v4  ;;  %v2837_v27 = vadd.f32 %v2814_v30, %v2608_v57 }
 0x590   : > { %2853 = vst [vmem:[%s4710_s29 + $0x70] sm:$0xff] %v2837_v27 }
 0x591 PF: > { %s25_s18 = sadd.s32 1, %s3551_s18  }
 0x592   : > { %p22_p4 = scmp.ge.s32.totalorder %s25_s18, 4  }
 0x594   :  { %24 = sbr.rel (!%p22_p4) target bundleno = 1 (0x1), region = 110 }

</bundles_post_ra>
